<compile_context>
chip_gen: v6e
topology: v6e:2x2x1
jax: 0.10.0
libtpu: 0.0.40
codegen_flags: <defaults>
</compile_context>

<pallas_src>
import jax
import jax.numpy as jnp
from jax import lax
from jax.experimental import pallas as pl
from jax.experimental.pallas import tpu as pltpu

INPUT_SIZE = 28
HIDDEN = 64
OUT = 10


def lstm_kernel(x_ref, wih_ref, whh_ref, bias_ref, wout_ref, bout_ref, out_ref):
    B, T, D = x_ref.shape
    H = HIDDEN
    G = 4 * H

    # Per-lane affine that turns tanh into the right activation per gate:
    #   i, f, o columns: 0.5*tanh(.) + 0.5  (== sigmoid, since pre-acts were
    #                                        pre-scaled by 1/2 host-side)
    #   g columns      : tanh(.)
    lane = lax.broadcasted_iota(jnp.int32, (1, G), 1)
    is_g = (lane >= 2 * H) & (lane < 3 * H)
    post_scale = jnp.where(is_g, 1.0, 0.5).astype(jnp.float32)
    post_bias = jnp.where(is_g, 0.0, 0.5).astype(jnp.float32)

    # Precompute the input projection (+ bias) for all timesteps in one big
    # matmul: (B*T, D) @ (D, 4H).  The reshape only merges leading dims
    # (T == 8 sublanes per batch slab), so it is a free reinterpretation.
    x_all = x_ref[...].reshape(B * T, D)
    xg_all = (jnp.dot(x_all, wih_ref[...], preferred_element_type=jnp.float32)
              + bias_ref[...])                        # (B*T, 4H)
    xg = xg_all.reshape(B, T, G)                      # row b*T+t -> [b, t, :]

    whh = whh_ref[...]                                # (H, 4H), stays in vregs
    h = jnp.zeros((B, H), jnp.float32)
    c = jnp.zeros((B, H), jnp.float32)

    # T is small and static: a fully unrolled loop with static slices keeps
    # everything visible to the scheduler and leaves only one MXU dot on the
    # serial dependency chain per step.
    for t in range(T):
        pre = xg[:, t, :] + jnp.dot(h, whh, preferred_element_type=jnp.float32)
        acts = jnp.tanh(pre) * post_scale + post_bias  # (B, 4H)
        i_g = acts[:, 0 * H:1 * H]
        f_g = acts[:, 1 * H:2 * H]
        g_g = acts[:, 2 * H:3 * H]
        o_g = acts[:, 3 * H:4 * H]
        c = f_g * c + i_g * g_g
        h = o_g * jnp.tanh(c)

    out_ref[...] = (jnp.dot(h, wout_ref[...], preferred_element_type=jnp.float32)
                    + bout_ref[...])


@jax.jit
def rnn_forward(x_btd, w_ih, w_hh, b_ih, b_hh, w_out, b_out):
    """x_btd: (B, T, INPUT_SIZE) float32 (batch_first, like PyTorch)."""
    B, T, D = x_btd.shape
    H = HIDDEN
    G = 4 * H

    # Fold the 1/2 of sigmoid(z) = 0.5*tanh(z/2)+0.5 into the sigmoid-gate
    # (i, f, o) columns of the weights and bias; leave the g (tanh) columns.
    cols = jnp.arange(G)
    gate_scale = jnp.where((cols >= 2 * H) & (cols < 3 * H), 1.0, 0.5)
    gate_scale = gate_scale.astype(jnp.float32)

    wih_s = w_ih.T * gate_scale[None, :]               # (D, 4H)
    whh_s = w_hh.T * gate_scale[None, :]               # (H, 4H)
    bias_s = ((b_ih + b_hh) * gate_scale)[None, :]     # (1, 4H)
    wout_t = w_out.T                                   # (H, OUT)
    bout = b_out[None, :]                              # (1, OUT)

    return pl.pallas_call(
        lstm_kernel,
        out_shape=jax.ShapeDtypeStruct((B, OUT), jnp.float32),
        grid=(1,),
        in_specs=[
            pl.BlockSpec((B, T, D), lambda i: (0, 0, 0)),
            pl.BlockSpec((D, G), lambda i: (0, 0)),
            pl.BlockSpec((H, G), lambda i: (0, 0)),
            pl.BlockSpec((1, G), lambda i: (0, 0)),
            pl.BlockSpec((H, OUT), lambda i: (0, 0)),
            pl.BlockSpec((1, OUT), lambda i: (0, 0)),
        ],
        out_specs=pl.BlockSpec((B, OUT), lambda i: (0, 0)),
        compiler_params=pltpu.CompilerParams(
            dimension_semantics=("arbitrary",)),
    )(x_btd, wih_s, whh_s, bias_s, wout_t, bout)


def rnn_forward_ref(x_btd, w_ih, w_hh, b_ih, b_hh, w_out, b_out):
    """Plain-JAX reference matching PyTorch LSTM semantics (gate order i,f,g,o)."""
    B, T, D = x_btd.shape
    H = HIDDEN

    def step(carry, x_t):
        h, c = carry
        gates = x_t @ w_ih.T + h @ w_hh.T + b_ih + b_hh
        i = jax.nn.sigmoid(gates[:, 0 * H:1 * H])
        f = jax.nn.sigmoid(gates[:, 1 * H:2 * H])
        g = jnp.tanh(gates[:, 2 * H:3 * H])
        o = jax.nn.sigmoid(gates[:, 3 * H:4 * H])
        c = f * c + i * g
        h = o * jnp.tanh(c)
        return (h, c), h

    h0 = jnp.zeros((B, H), jnp.float32)
    c0 = jnp.zeros((B, H), jnp.float32)
    (h_last, _), _ = lax.scan(step, (h0, c0), jnp.transpose(x_btd, (1, 0, 2)))
    return h_last @ w_out.T + b_out


if __name__ == "__main__":
    key = jax.random.PRNGKey(0)
    B, T = 8, 8

    ks = jax.random.split(key, 7)
    scale = 1.0 / jnp.sqrt(jnp.float32(HIDDEN))
    x = jax.random.normal(ks[0], (B, T, INPUT_SIZE), jnp.float32)
    w_ih = jax.random.uniform(ks[1], (4 * HIDDEN, INPUT_SIZE), jnp.float32,
                              -scale, scale)
    w_hh = jax.random.uniform(ks[2], (4 * HIDDEN, HIDDEN), jnp.float32,
                              -scale, scale)
    b_ih = jax.random.uniform(ks[3], (4 * HIDDEN,), jnp.float32, -scale, scale)
    b_hh = jax.random.uniform(ks[4], (4 * HIDDEN,), jnp.float32, -scale, scale)
    w_out = jax.random.uniform(ks[5], (OUT, HIDDEN), jnp.float32, -scale, scale)
    b_out = jax.random.uniform(ks[6], (OUT,), jnp.float32, -scale, scale)

    out = rnn_forward(x, w_ih, w_hh, b_ih, b_hh, w_out, b_out)
    out = jax.block_until_ready(out)

    ref = rnn_forward_ref(x, w_ih, w_hh, b_ih, b_hh, w_out, b_out)
    assert out.shape == (B, OUT)
    max_err = jnp.max(jnp.abs(out - ref))
    # tanh-based sigmoid is an exact identity; tolerance covers rounding only.
    assert max_err < 2e-5, f"max abs err {max_err}"

    print("KERNEL_OK")
</pallas_src>

<mosaic_0001>
module attributes {stable_mosaic.version = 11 : i64} {
  func.func @lstm_kernel(%arg0: i32, %arg1: memref<8x8x28xf32, #tpu.memory_space<vmem>>, %arg2: memref<28x256xf32, #tpu.memory_space<vmem>>, %arg3: memref<64x256xf32, #tpu.memory_space<vmem>>, %arg4: memref<1x256xf32, #tpu.memory_space<vmem>>, %arg5: memref<64x10xf32, #tpu.memory_space<vmem>>, %arg6: memref<1x10xf32, #tpu.memory_space<vmem>>, %arg7: memref<8x10xf32, #tpu.memory_space<vmem>>) attributes {dimension_semantics = [#tpu.dimension_semantics<arbitrary>], iteration_bounds = array<i64: 1>, scalar_prefetch = 0 : i64, scratch_operands = 0 : i64, tpu.core_type = #tpu.core_type<tc>, window_params = [{pipeline_mode = #tpu.pipeline_mode<synchronous>, transform_indices = @transform_0, window_bounds = array<i64: 8, 8, 28>}, {pipeline_mode = #tpu.pipeline_mode<synchronous>, transform_indices = @transform_1, window_bounds = array<i64: 28, 256>}, {pipeline_mode = #tpu.pipeline_mode<synchronous>, transform_indices = @transform_2, window_bounds = array<i64: 64, 256>}, {pipeline_mode = #tpu.pipeline_mode<synchronous>, transform_indices = @transform_3, window_bounds = array<i64: 1, 256>}, {pipeline_mode = #tpu.pipeline_mode<synchronous>, transform_indices = @transform_4, window_bounds = array<i64: 64, 10>}, {pipeline_mode = #tpu.pipeline_mode<synchronous>, transform_indices = @transform_5, window_bounds = array<i64: 1, 10>}, {pipeline_mode = #tpu.pipeline_mode<synchronous>, transform_indices = @transform_6, window_bounds = array<i64: 8, 10>}]} {
    %0 = tpu.iota {dimensions = array<i32: 1>} : vector<1x256xi32>
    %c128_i32 = arith.constant 128 : i32
    %1 = vector.broadcast %c128_i32 : i32 to vector<1x256xi32>
    %2 = arith.cmpi sge, %0, %1 : vector<1x256xi32>
    %c192_i32 = arith.constant 192 : i32
    %3 = vector.broadcast %c192_i32 : i32 to vector<1x256xi32>
    %4 = arith.cmpi slt, %0, %3 : vector<1x256xi32>
    %5 = arith.andi %2, %4 : vector<1x256xi1>
    %cst = arith.constant 1.000000e+00 : f32
    %cst_0 = arith.constant 5.000000e-01 : f32
    %6 = vector.broadcast %cst : f32 to vector<1x256xf32>
    %7 = vector.broadcast %cst_0 : f32 to vector<1x256xf32>
    %8 = arith.select %5, %6, %7 : vector<1x256xi1>, vector<1x256xf32>
    %cst_1 = arith.constant 0.000000e+00 : f32
    %cst_2 = arith.constant 5.000000e-01 : f32
    %9 = vector.broadcast %cst_1 : f32 to vector<1x256xf32>
    %10 = vector.broadcast %cst_2 : f32 to vector<1x256xf32>
    %11 = arith.select %5, %9, %10 : vector<1x256xi1>, vector<1x256xf32>
    %c0 = arith.constant 0 : index
    %c0_3 = arith.constant 0 : index
    %c0_4 = arith.constant 0 : index
    %12 = vector.load %arg1[%c0, %c0_3, %c0_4] : memref<8x8x28xf32, #tpu.memory_space<vmem>>, vector<8x8x28xf32>
    %13 = vector.shape_cast %12 : vector<8x8x28xf32> to vector<64x28xf32>
    %c0_5 = arith.constant 0 : index
    %c0_6 = arith.constant 0 : index
    %14 = vector.load %arg2[%c0_5, %c0_6] : memref<28x256xf32, #tpu.memory_space<vmem>>, vector<28x256xf32>
    %cst_7 = arith.constant dense<0.000000e+00> : vector<64x256xf32>
    %15 = tpu.matmul %13, %14, %cst_7 {dimension_numbers = #tpu.dot_dimension_numbers<[1], [0], [0], [1], [0, 0, 1, 1], [], []>} : vector<64x28xf32>, vector<28x256xf32>, vector<64x256xf32> -> vector<64x256xf32>
    %c0_8 = arith.constant 0 : index
    %c0_9 = arith.constant 0 : index
    %16 = vector.load %arg4[%c0_8, %c0_9] : memref<1x256xf32, #tpu.memory_space<vmem>>, vector<1x256xf32>
    %17 = vector.broadcast %16 : vector<1x256xf32> to vector<64x256xf32>
    %18 = arith.addf %15, %17 : vector<64x256xf32>
    %19 = vector.shape_cast %18 : vector<64x256xf32> to vector<8x8x256xf32>
    %c0_10 = arith.constant 0 : index
    %c0_11 = arith.constant 0 : index
    %20 = vector.load %arg3[%c0_10, %c0_11] : memref<64x256xf32, #tpu.memory_space<vmem>>, vector<64x256xf32>
    %cst_12 = arith.constant 0.000000e+00 : f32
    %21 = vector.broadcast %cst_12 : f32 to vector<8x64xf32>
    %cst_13 = arith.constant 0.000000e+00 : f32
    %22 = vector.broadcast %cst_13 : f32 to vector<8x64xf32>
    %23 = vector.extract_strided_slice %19 {offsets = [0, 0, 0], sizes = [8, 1, 256], strides = [1, 1, 1]} : vector<8x8x256xf32> to vector<8x1x256xf32>
    %24 = vector.shape_cast %23 : vector<8x1x256xf32> to vector<8x256xf32>
    %cst_14 = arith.constant dense<0.000000e+00> : vector<8x256xf32>
    %25 = tpu.matmul %21, %20, %cst_14 {dimension_numbers = #tpu.dot_dimension_numbers<[1], [0], [0], [1], [0, 0, 1, 1], [], []>} : vector<8x64xf32>, vector<64x256xf32>, vector<8x256xf32> -> vector<8x256xf32>
    %26 = arith.addf %24, %25 : vector<8x256xf32>
    %27 = math.tanh %26 : vector<8x256xf32>
    %28 = vector.broadcast %8 : vector<1x256xf32> to vector<8x256xf32>
    %29 = arith.mulf %27, %28 : vector<8x256xf32>
    %30 = vector.broadcast %11 : vector<1x256xf32> to vector<8x256xf32>
    %31 = arith.addf %29, %30 : vector<8x256xf32>
    %32 = vector.extract_strided_slice %31 {offsets = [0, 0], sizes = [8, 64], strides = [1, 1]} : vector<8x256xf32> to vector<8x64xf32>
    %33 = vector.extract_strided_slice %31 {offsets = [0, 64], sizes = [8, 64], strides = [1, 1]} : vector<8x256xf32> to vector<8x64xf32>
    %34 = vector.extract_strided_slice %31 {offsets = [0, 128], sizes = [8, 64], strides = [1, 1]} : vector<8x256xf32> to vector<8x64xf32>
    %35 = vector.extract_strided_slice %31 {offsets = [0, 192], sizes = [8, 64], strides = [1, 1]} : vector<8x256xf32> to vector<8x64xf32>
    %36 = arith.mulf %33, %22 : vector<8x64xf32>
    %37 = arith.mulf %32, %34 : vector<8x64xf32>
    %38 = arith.addf %36, %37 : vector<8x64xf32>
    %39 = math.tanh %38 : vector<8x64xf32>
    %40 = arith.mulf %35, %39 : vector<8x64xf32>
    %41 = vector.extract_strided_slice %19 {offsets = [0, 1, 0], sizes = [8, 1, 256], strides = [1, 1, 1]} : vector<8x8x256xf32> to vector<8x1x256xf32>
    %42 = vector.shape_cast %41 : vector<8x1x256xf32> to vector<8x256xf32>
    %cst_15 = arith.constant dense<0.000000e+00> : vector<8x256xf32>
    %43 = tpu.matmul %40, %20, %cst_15 {dimension_numbers = #tpu.dot_dimension_numbers<[1], [0], [0], [1], [0, 0, 1, 1], [], []>} : vector<8x64xf32>, vector<64x256xf32>, vector<8x256xf32> -> vector<8x256xf32>
    %44 = arith.addf %42, %43 : vector<8x256xf32>
    %45 = math.tanh %44 : vector<8x256xf32>
    %46 = vector.broadcast %8 : vector<1x256xf32> to vector<8x256xf32>
    %47 = arith.mulf %45, %46 : vector<8x256xf32>
    %48 = vector.broadcast %11 : vector<1x256xf32> to vector<8x256xf32>
    %49 = arith.addf %47, %48 : vector<8x256xf32>
    %50 = vector.extract_strided_slice %49 {offsets = [0, 0], sizes = [8, 64], strides = [1, 1]} : vector<8x256xf32> to vector<8x64xf32>
    %51 = vector.extract_strided_slice %49 {offsets = [0, 64], sizes = [8, 64], strides = [1, 1]} : vector<8x256xf32> to vector<8x64xf32>
    %52 = vector.extract_strided_slice %49 {offsets = [0, 128], sizes = [8, 64], strides = [1, 1]} : vector<8x256xf32> to vector<8x64xf32>
    %53 = vector.extract_strided_slice %49 {offsets = [0, 192], sizes = [8, 64], strides = [1, 1]} : vector<8x256xf32> to vector<8x64xf32>
    %54 = arith.mulf %51, %38 : vector<8x64xf32>
    %55 = arith.mulf %50, %52 : vector<8x64xf32>
    %56 = arith.addf %54, %55 : vector<8x64xf32>
    %57 = math.tanh %56 : vector<8x64xf32>
    %58 = arith.mulf %53, %57 : vector<8x64xf32>
    %59 = vector.extract_strided_slice %19 {offsets = [0, 2, 0], sizes = [8, 1, 256], strides = [1, 1, 1]} : vector<8x8x256xf32> to vector<8x1x256xf32>
    %60 = vector.shape_cast %59 : vector<8x1x256xf32> to vector<8x256xf32>
    %cst_16 = arith.constant dense<0.000000e+00> : vector<8x256xf32>
    %61 = tpu.matmul %58, %20, %cst_16 {dimension_numbers = #tpu.dot_dimension_numbers<[1], [0], [0], [1], [0, 0, 1, 1], [], []>} : vector<8x64xf32>, vector<64x256xf32>, vector<8x256xf32> -> vector<8x256xf32>
    %62 = arith.addf %60, %61 : vector<8x256xf32>
    %63 = math.tanh %62 : vector<8x256xf32>
    %64 = vector.broadcast %8 : vector<1x256xf32> to vector<8x256xf32>
    %65 = arith.mulf %63, %64 : vector<8x256xf32>
    %66 = vector.broadcast %11 : vector<1x256xf32> to vector<8x256xf32>
    %67 = arith.addf %65, %66 : vector<8x256xf32>
    %68 = vector.extract_strided_slice %67 {offsets = [0, 0], sizes = [8, 64], strides = [1, 1]} : vector<8x256xf32> to vector<8x64xf32>
    %69 = vector.extract_strided_slice %67 {offsets = [0, 64], sizes = [8, 64], strides = [1, 1]} : vector<8x256xf32> to vector<8x64xf32>
    %70 = vector.extract_strided_slice %67 {offsets = [0, 128], sizes = [8, 64], strides = [1, 1]} : vector<8x256xf32> to vector<8x64xf32>
    %71 = vector.extract_strided_slice %67 {offsets = [0, 192], sizes = [8, 64], strides = [1, 1]} : vector<8x256xf32> to vector<8x64xf32>
    %72 = arith.mulf %69, %56 : vector<8x64xf32>
    %73 = arith.mulf %68, %70 : vector<8x64xf32>
    %74 = arith.addf %72, %73 : vector<8x64xf32>
    %75 = math.tanh %74 : vector<8x64xf32>
    %76 = arith.mulf %71, %75 : vector<8x64xf32>
    %77 = vector.extract_strided_slice %19 {offsets = [0, 3, 0], sizes = [8, 1, 256], strides = [1, 1, 1]} : vector<8x8x256xf32> to vector<8x1x256xf32>
    %78 = vector.shape_cast %77 : vector<8x1x256xf32> to vector<8x256xf32>
    %cst_17 = arith.constant dense<0.000000e+00> : vector<8x256xf32>
    %79 = tpu.matmul %76, %20, %cst_17 {dimension_numbers = #tpu.dot_dimension_numbers<[1], [0], [0], [1], [0, 0, 1, 1], [], []>} : vector<8x64xf32>, vector<64x256xf32>, vector<8x256xf32> -> vector<8x256xf32>
    %80 = arith.addf %78, %79 : vector<8x256xf32>
    %81 = math.tanh %80 : vector<8x256xf32>
    %82 = vector.broadcast %8 : vector<1x256xf32> to vector<8x256xf32>
    %83 = arith.mulf %81, %82 : vector<8x256xf32>
    %84 = vector.broadcast %11 : vector<1x256xf32> to vector<8x256xf32>
    %85 = arith.addf %83, %84 : vector<8x256xf32>
    %86 = vector.extract_strided_slice %85 {offsets = [0, 0], sizes = [8, 64], strides = [1, 1]} : vector<8x256xf32> to vector<8x64xf32>
    %87 = vector.extract_strided_slice %85 {offsets = [0, 64], sizes = [8, 64], strides = [1, 1]} : vector<8x256xf32> to vector<8x64xf32>
    %88 = vector.extract_strided_slice %85 {offsets = [0, 128], sizes = [8, 64], strides = [1, 1]} : vector<8x256xf32> to vector<8x64xf32>
    %89 = vector.extract_strided_slice %85 {offsets = [0, 192], sizes = [8, 64], strides = [1, 1]} : vector<8x256xf32> to vector<8x64xf32>
    %90 = arith.mulf %87, %74 : vector<8x64xf32>
    %91 = arith.mulf %86, %88 : vector<8x64xf32>
    %92 = arith.addf %90, %91 : vector<8x64xf32>
    %93 = math.tanh %92 : vector<8x64xf32>
    %94 = arith.mulf %89, %93 : vector<8x64xf32>
    %95 = vector.extract_strided_slice %19 {offsets = [0, 4, 0], sizes = [8, 1, 256], strides = [1, 1, 1]} : vector<8x8x256xf32> to vector<8x1x256xf32>
    %96 = vector.shape_cast %95 : vector<8x1x256xf32> to vector<8x256xf32>
    %cst_18 = arith.constant dense<0.000000e+00> : vector<8x256xf32>
    %97 = tpu.matmul %94, %20, %cst_18 {dimension_numbers = #tpu.dot_dimension_numbers<[1], [0], [0], [1], [0, 0, 1, 1], [], []>} : vector<8x64xf32>, vector<64x256xf32>, vector<8x256xf32> -> vector<8x256xf32>
    %98 = arith.addf %96, %97 : vector<8x256xf32>
    %99 = math.tanh %98 : vector<8x256xf32>
    %100 = vector.broadcast %8 : vector<1x256xf32> to vector<8x256xf32>
    %101 = arith.mulf %99, %100 : vector<8x256xf32>
    %102 = vector.broadcast %11 : vector<1x256xf32> to vector<8x256xf32>
    %103 = arith.addf %101, %102 : vector<8x256xf32>
    %104 = vector.extract_strided_slice %103 {offsets = [0, 0], sizes = [8, 64], strides = [1, 1]} : vector<8x256xf32> to vector<8x64xf32>
    %105 = vector.extract_strided_slice %103 {offsets = [0, 64], sizes = [8, 64], strides = [1, 1]} : vector<8x256xf32> to vector<8x64xf32>
    %106 = vector.extract_strided_slice %103 {offsets = [0, 128], sizes = [8, 64], strides = [1, 1]} : vector<8x256xf32> to vector<8x64xf32>
    %107 = vector.extract_strided_slice %103 {offsets = [0, 192], sizes = [8, 64], strides = [1, 1]} : vector<8x256xf32> to vector<8x64xf32>
    %108 = arith.mulf %105, %92 : vector<8x64xf32>
    %109 = arith.mulf %104, %106 : vector<8x64xf32>
    %110 = arith.addf %108, %109 : vector<8x64xf32>
    %111 = math.tanh %110 : vector<8x64xf32>
    %112 = arith.mulf %107, %111 : vector<8x64xf32>
    %113 = vector.extract_strided_slice %19 {offsets = [0, 5, 0], sizes = [8, 1, 256], strides = [1, 1, 1]} : vector<8x8x256xf32> to vector<8x1x256xf32>
    %114 = vector.shape_cast %113 : vector<8x1x256xf32> to vector<8x256xf32>
    %cst_19 = arith.constant dense<0.000000e+00> : vector<8x256xf32>
    %115 = tpu.matmul %112, %20, %cst_19 {dimension_numbers = #tpu.dot_dimension_numbers<[1], [0], [0], [1], [0, 0, 1, 1], [], []>} : vector<8x64xf32>, vector<64x256xf32>, vector<8x256xf32> -> vector<8x256xf32>
    %116 = arith.addf %114, %115 : vector<8x256xf32>
    %117 = math.tanh %116 : vector<8x256xf32>
    %118 = vector.broadcast %8 : vector<1x256xf32> to vector<8x256xf32>
    %119 = arith.mulf %117, %118 : vector<8x256xf32>
    %120 = vector.broadcast %11 : vector<1x256xf32> to vector<8x256xf32>
    %121 = arith.addf %119, %120 : vector<8x256xf32>
    %122 = vector.extract_strided_slice %121 {offsets = [0, 0], sizes = [8, 64], strides = [1, 1]} : vector<8x256xf32> to vector<8x64xf32>
    %123 = vector.extract_strided_slice %121 {offsets = [0, 64], sizes = [8, 64], strides = [1, 1]} : vector<8x256xf32> to vector<8x64xf32>
    %124 = vector.extract_strided_slice %121 {offsets = [0, 128], sizes = [8, 64], strides = [1, 1]} : vector<8x256xf32> to vector<8x64xf32>
    %125 = vector.extract_strided_slice %121 {offsets = [0, 192], sizes = [8, 64], strides = [1, 1]} : vector<8x256xf32> to vector<8x64xf32>
    %126 = arith.mulf %123, %110 : vector<8x64xf32>
    %127 = arith.mulf %122, %124 : vector<8x64xf32>
    %128 = arith.addf %126, %127 : vector<8x64xf32>
    %129 = math.tanh %128 : vector<8x64xf32>
    %130 = arith.mulf %125, %129 : vector<8x64xf32>
    %131 = vector.extract_strided_slice %19 {offsets = [0, 6, 0], sizes = [8, 1, 256], strides = [1, 1, 1]} : vector<8x8x256xf32> to vector<8x1x256xf32>
    %132 = vector.shape_cast %131 : vector<8x1x256xf32> to vector<8x256xf32>
    %cst_20 = arith.constant dense<0.000000e+00> : vector<8x256xf32>
    %133 = tpu.matmul %130, %20, %cst_20 {dimension_numbers = #tpu.dot_dimension_numbers<[1], [0], [0], [1], [0, 0, 1, 1], [], []>} : vector<8x64xf32>, vector<64x256xf32>, vector<8x256xf32> -> vector<8x256xf32>
    %134 = arith.addf %132, %133 : vector<8x256xf32>
    %135 = math.tanh %134 : vector<8x256xf32>
    %136 = vector.broadcast %8 : vector<1x256xf32> to vector<8x256xf32>
    %137 = arith.mulf %135, %136 : vector<8x256xf32>
    %138 = vector.broadcast %11 : vector<1x256xf32> to vector<8x256xf32>
    %139 = arith.addf %137, %138 : vector<8x256xf32>
    %140 = vector.extract_strided_slice %139 {offsets = [0, 0], sizes = [8, 64], strides = [1, 1]} : vector<8x256xf32> to vector<8x64xf32>
    %141 = vector.extract_strided_slice %139 {offsets = [0, 64], sizes = [8, 64], strides = [1, 1]} : vector<8x256xf32> to vector<8x64xf32>
    %142 = vector.extract_strided_slice %139 {offsets = [0, 128], sizes = [8, 64], strides = [1, 1]} : vector<8x256xf32> to vector<8x64xf32>
    %143 = vector.extract_strided_slice %139 {offsets = [0, 192], sizes = [8, 64], strides = [1, 1]} : vector<8x256xf32> to vector<8x64xf32>
    %144 = arith.mulf %141, %128 : vector<8x64xf32>
    %145 = arith.mulf %140, %142 : vector<8x64xf32>
    %146 = arith.addf %144, %145 : vector<8x64xf32>
    %147 = math.tanh %146 : vector<8x64xf32>
    %148 = arith.mulf %143, %147 : vector<8x64xf32>
    %149 = vector.extract_strided_slice %19 {offsets = [0, 7, 0], sizes = [8, 1, 256], strides = [1, 1, 1]} : vector<8x8x256xf32> to vector<8x1x256xf32>
    %150 = vector.shape_cast %149 : vector<8x1x256xf32> to vector<8x256xf32>
    %cst_21 = arith.constant dense<0.000000e+00> : vector<8x256xf32>
    %151 = tpu.matmul %148, %20, %cst_21 {dimension_numbers = #tpu.dot_dimension_numbers<[1], [0], [0], [1], [0, 0, 1, 1], [], []>} : vector<8x64xf32>, vector<64x256xf32>, vector<8x256xf32> -> vector<8x256xf32>
    %152 = arith.addf %150, %151 : vector<8x256xf32>
    %153 = math.tanh %152 : vector<8x256xf32>
    %154 = vector.broadcast %8 : vector<1x256xf32> to vector<8x256xf32>
    %155 = arith.mulf %153, %154 : vector<8x256xf32>
    %156 = vector.broadcast %11 : vector<1x256xf32> to vector<8x256xf32>
    %157 = arith.addf %155, %156 : vector<8x256xf32>
    %158 = vector.extract_strided_slice %157 {offsets = [0, 0], sizes = [8, 64], strides = [1, 1]} : vector<8x256xf32> to vector<8x64xf32>
    %159 = vector.extract_strided_slice %157 {offsets = [0, 64], sizes = [8, 64], strides = [1, 1]} : vector<8x256xf32> to vector<8x64xf32>
    %160 = vector.extract_strided_slice %157 {offsets = [0, 128], sizes = [8, 64], strides = [1, 1]} : vector<8x256xf32> to vector<8x64xf32>
    %161 = vector.extract_strided_slice %157 {offsets = [0, 192], sizes = [8, 64], strides = [1, 1]} : vector<8x256xf32> to vector<8x64xf32>
    %162 = arith.mulf %159, %146 : vector<8x64xf32>
    %163 = arith.mulf %158, %160 : vector<8x64xf32>
    %164 = arith.addf %162, %163 : vector<8x64xf32>
    %165 = math.tanh %164 : vector<8x64xf32>
    %166 = arith.mulf %161, %165 : vector<8x64xf32>
    %c0_22 = arith.constant 0 : index
    %c0_23 = arith.constant 0 : index
    %167 = vector.load %arg5[%c0_22, %c0_23] : memref<64x10xf32, #tpu.memory_space<vmem>>, vector<64x10xf32>
    %cst_24 = arith.constant dense<0.000000e+00> : vector<8x10xf32>
    %168 = tpu.matmul %166, %167, %cst_24 {dimension_numbers = #tpu.dot_dimension_numbers<[1], [0], [0], [1], [0, 0, 1, 1], [], []>} : vector<8x64xf32>, vector<64x10xf32>, vector<8x10xf32> -> vector<8x10xf32>
    %c0_25 = arith.constant 0 : index
    %c0_26 = arith.constant 0 : index
    %169 = vector.load %arg6[%c0_25, %c0_26] : memref<1x10xf32, #tpu.memory_space<vmem>>, vector<1x10xf32>
    %170 = vector.broadcast %169 : vector<1x10xf32> to vector<8x10xf32>
    %171 = arith.addf %168, %170 : vector<8x10xf32>
    %c0_27 = arith.constant 0 : index
    %c0_28 = arith.constant 0 : index
    %172 = vector.load %arg7[%c0_27, %c0_28] : memref<8x10xf32, #tpu.memory_space<vmem>>, vector<8x10xf32>
    tpu.vector_store %arg7[%c0_27, %c0_28], %171 {strides = array<i32>} : memref<8x10xf32, #tpu.memory_space<vmem>>, vector<8x10xf32>,
    return
  }
  func.func @transform_0(%arg0: i32) -> (i32, i32, i32) {
    %c0_i32 = arith.constant 0 : i32
    %c0_i32_0 = arith.constant 0 : i32
    %c0_i32_1 = arith.constant 0 : i32
    %c0_i32_2 = arith.constant 0 : i32
    return %c0_i32, %c0_i32_0, %c0_i32_1 : i32, i32, i32
  }
  func.func @transform_1(%arg0: i32) -> (i32, i32) {
    %c0_i32 = arith.constant 0 : i32
    %c0_i32_0 = arith.constant 0 : i32
    %c0_i32_1 = arith.constant 0 : i32
    return %c0_i32, %c0_i32_0 : i32, i32
  }
  func.func @transform_2(%arg0: i32) -> (i32, i32) {
    %c0_i32 = arith.constant 0 : i32
    %c0_i32_0 = arith.constant 0 : i32
    %c0_i32_1 = arith.constant 0 : i32
    return %c0_i32, %c0_i32_0 : i32, i32
  }
  func.func @transform_3(%arg0: i32) -> (i32, i32) {
    %c0_i32 = arith.constant 0 : i32
    %c0_i32_0 = arith.constant 0 : i32
    %c0_i32_1 = arith.constant 0 : i32
    return %c0_i32, %c0_i32_0 : i32, i32
  }
  func.func @transform_4(%arg0: i32) -> (i32, i32) {
    %c0_i32 = arith.constant 0 : i32
    %c0_i32_0 = arith.constant 0 : i32
    %c0_i32_1 = arith.constant 0 : i32
    return %c0_i32, %c0_i32_0 : i32, i32
  }
  func.func @transform_5(%arg0: i32) -> (i32, i32) {
    %c0_i32 = arith.constant 0 : i32
    %c0_i32_0 = arith.constant 0 : i32
    %c0_i32_1 = arith.constant 0 : i32
    return %c0_i32, %c0_i32_0 : i32, i32
  }
  func.func @transform_6(%arg0: i32) -> (i32, i32) {
    %c0_i32 = arith.constant 0 : i32
    %c0_i32_0 = arith.constant 0 : i32
    %c0_i32_1 = arith.constant 0 : i32
    return %c0_i32, %c0_i32_0 : i32, i32
  }
}

</mosaic_0001>

<bundles_post_ra>
// kernel: rnn_forward.1
= control target key start
LH: loop header
LB: loop body
LE: loop exit
PB: predicated region body
PF: predicated region fallthrough
CT: control target
= control target key end

     0   :  { %vm90_vm0 = vcmask 1043456   ;;  %vm65_vm1 = vcmask 228352   ;;  %v4484_v18 = vmov 0.0   ;;  %s4477_s0 = inlined_call_operand.vmem [shape: f32[8,8,28], index: 0, kind: input, shape index: {}]   ;;  %s4478_s1 = inlined_call_operand.vmem [shape: f32[28,256], index: 1, kind: input, shape index: {}]   ;;  %s4479_s2 = inlined_call_operand.vmem [shape: f32[64,256], index: 2, kind: input, shape index: {}]   ;;  %s4480_s3 = inlined_call_operand.vmem [shape: f32[1,256], index: 3, kind: input, shape index: {}]   ;;  %s4481_s4 = inlined_call_operand.vmem [shape: f32[64,10], index: 4, kind: input, shape index: {}]   ;;  %s4482_s5 = inlined_call_operand.vmem [shape: f32[1,10], index: 5, kind: input, shape index: {}]   ;;  %s4483_s6 = inlined_call_operand.hbm [shape: f32[8,10], index: 6, kind: output, shape index: {}]  }
   0x1   :  { %v52_v0 = vld [vmem:[%s4478_s1 + $0x38] sm:$0xf]  ;;  %v51_v2 = vld [vmem:[%s4478_s1 + $0x30] sm:$0xf]  ;;  %v50_v4 = vld [vmem:[%s4478_s1 + $0x28] sm:$0xff]  ;;  %161 = vmatprep.mubr.f32.mxu0 %v4484_v18  ;;  %294 = vmatprep.mubr.f32.mxu1 %v4484_v18 }
   0x2   :  { %v3158_v1 = vld [vmem:[%s4479_s2 + $0x78] sm:$0xff]  ;;  %2626 = vmatprep.subr.msk.mxu0 %vm90_vm0, %v52_v0  ;;  %v3167_v3 = vld [vmem:[%s4479_s2 + $0x70] sm:$0xff]  ;;  %v3175_v5 = vld [vmem:[%s4479_s2 + $0x68] sm:$0xff] }
   0x3   :  { %246 = vmatprep.subr.mxu1 %v3158_v1  ;;  %2627 = vmatpush1.msk.msra.mxu0 %vm90_vm0, %v51_v2  ;;  %v49_v6 = vld [vmem:[%s4478_s1 + $0x20] sm:$0xff]  ;;  %v48_v8 = vld [vmem:[%s4478_s1 + $0x18] sm:$0xff]  ;;  %v47_v10 = vld [vmem:[%s4478_s1 + $0x10] sm:$0xff] }
   0x4   :  { %247 = vmatpush1.msra.mxu1 %v3167_v3  ;;  %v3184_v7 = vld [vmem:[%s4479_s2 + $0x60] sm:$0xff]  ;;  %123 = vmatprep.subr.mxu0 %v50_v4  ;;  %v3193_v9 = vld [vmem:[%s4479_s2 + $0x58] sm:$0xff]  ;;  %v3201_v11 = vld [vmem:[%s4479_s2 + $0x50] sm:$0xff] }
   0x5   :  { %248 = vmatprep.subr.mxu1 %v3175_v5  ;;  %124 = vmatpush1.msra.mxu0 %v49_v6  ;;  %v46_v12 = vld [vmem:[%s4478_s1 + $0x8] sm:$0xff]  ;;  %v45_v14 = vld [vmem:[%s4478_s1] sm:$0xff]  ;;  %v3229_v17 = vld [vmem:[%s4479_s2 + $0x38] sm:$0xff] }
   0x6   :  { %249 = vmatpush1.msra.mxu1 %v3184_v7  ;;  %v3210_v13 = vld [vmem:[%s4479_s2 + $0x48] sm:$0xff]  ;;  %125 = vmatprep.subr.mxu0 %v48_v8  ;;  %v3220_v15 = vld [vmem:[%s4479_s2 + $0x40] sm:$0xff]  ;;  %v3235_v19 = vld [vmem:[%s4479_s2 + $0x30] sm:$0xff] }
   0x7   :  { %250 = vmatprep.subr.mxu1 %v3193_v9  ;;  %126 = vmatpush1.msra.mxu0 %v47_v10  ;;  %v37_v16 = vld [vmem:[%s4477_s0] sm:$0xff]  ;;  %v3242_v20 = vld [vmem:[%s4479_s2 + $0x28] sm:$0xff]  ;;  %v3258_v23 = vld [vmem:[%s4479_s2 + $0x18] sm:$0xff] }
   0x8   :  { %251 = vmatpush1.msra.mxu1 %v3201_v11  ;;  %127 = vmatprep.subr.mxu0 %v46_v12  ;;  %v3249_v21 = vld [vmem:[%s4479_s2 + $0x20] sm:$0xff]  ;;  %v38_v22 = vld [vmem:[%s4477_s0 + $0x8] sm:$0xff] }
   0x9   :  { %252 = vmatprep.subr.mxu1 %v3210_v13  ;;  %128 = vmatpush1.msra.mxu0 %v45_v14 }
   0xa   :  { %253 = vmatpush1.msra.mxu1 %v3220_v15  ;;  %2628 = vmatmul.mubr.msk.f32.vlgmr.msra.gmra.mxu0 %vm65_vm1, %v37_v16 }
   0xb   :  { %254 = vmatprep.subr.mxu1 %v3229_v17  ;;  %167 = vmatprep.mubr.f32.mxu0 %v4484_v18 }
   0xc   :  { %255 = vmatpush1.msra.mxu1 %v3235_v19 }
   0xd   :  { %11 = vsyncpa [#allocation3], 0  ;;  %256 = vmatprep.subr.mxu1 %v3242_v20  ;;  %v3265_v24 = vld [vmem:[%s4479_s2 + $0x10] sm:$0xff]  ;;  %807 = vmatprep.subr.mxu0 %v3158_v1  ;;  %v3273_v25 = vld [vmem:[%s4479_s2 + $0x8] sm:$0xff]  ;;  %v24_v33 = vlaneseq  ;;  %vm478_vm3 = vcmask 1041409   ;;  %vm481_vm4 = vcmask 1042434  }
   0xe   :  { %257 = vmatpush1.msra.mxu1 %v3249_v21  ;;  %2629 = vmatmul.mubr.msk.f32.gmra.mxu0 %vm65_vm1, %v38_v22  ;;  %v3280_v26 = vld [vmem:[%s4479_s2] sm:$0xff]  ;;  %v39_v27 = vld [vmem:[%s4477_s0 + $0x10] sm:$0xff]  ;;  %v40_v28 = vld [vmem:[%s4477_s0 + $0x18] sm:$0xff]  ;;  %vm484_vm5 = vcmask 1043459   ;;  %vm487_vm6 = vcmask 1044484   ;;  %vm490_vm7 = vcmask 1045509  }
   0xf   :  { %258 = vmatprep.subr.mxu1 %v3258_v23  ;;  %173 = vmatprep.mubr.f32.mxu0 %v4484_v18  ;;  %v41_v29 = vld [vmem:[%s4477_s0 + $0x20] sm:$0xff]  ;;  %v42_v30 = vld [vmem:[%s4477_s0 + $0x28] sm:$0xff]  ;;  %v43_v31 = vld [vmem:[%s4477_s0 + $0x30] sm:$0xff]  ;;  %v56_v34 = vshrl.u32 %v24_v33, 7  ;;  %v25_v47 = vand.u32 127, %v24_v33  ;;  %vm493_vm8 = vcmask 1046534  }
  0x10   :  { %259 = vmatpush1.msra.mxu1 %v3265_v24  ;;  %808 = vmatpush1.msra.mxu0 %v3167_v3  ;;  %v44_v32 = vld [vmem:[%s4477_s0 + $0x38] sm:$0xff]  ;;  %v53_v37 = vld [vmem:[%s4480_s3] sm:$0x3]  ;;  %s3114_s3 = smov 64   ;;  %vm496_vm9 = vcmask 1047559   ;;  %vm226_vm10 = vcmask 523264  }
  0x11   :  { %260 = vmatprep.subr.mxu1 %v3273_v25  ;;  %809 = vmatprep.subr.mxu0 %v3175_v5  ;;  %v57_v35 = vsub.s32 0, %v56_v34  ;;  %v61_v39 = vsub.s32 1, %v56_v34  ;;  %vm3115_vm11 = vmmov 0   ;;  %s3116_s8 = smov [#allocation2]   ;;  %vm2610_vm12 = vcmask 80896  }
  0x12   :  { %261 = vmatpush1.msra.mxu1 %v3280_v26  ;;  %2630 = vmatmul.mubr.msk.f32.gmra.mxu0 %vm65_vm1, %v39_v27  ;;  %s2618_s1 = sshll.u32 %s3116_s8, 4  ;;  %s2619_s1 = int_to_ptr.vmem [resolvable:$true] %s2618_s1 }
  0x13   :  { %295 = vmatmul.mubr.f32.vlgmr.msra.gmra.mxu1 %v4484_v18  ;;  %179 = vmatprep.mubr.f32.mxu0 %v4484_v18  ;;  %v3353_v40 = vrot.slane %v53_v37, %v57_v35  ;;  %v3355_v43 = vrot.slane %v53_v37, %v61_v39  ;;  %s3090_s9 = scalar_lea.vmem %s2619_s1, 128  ;;  %p3095_p1 = scmp.lt.s32.totalorder %s2619_s1, %s2619_s1 }
  0x14   :  { %518 = vmatprep.subr.mxu1 %v3158_v1  ;;  %566 = vmatprep.mubr.f32.mxu1 %v4484_v18  ;;  %p3091_p0 = scmp.ne.s32.totalorder %s2619_s1, %s3090_s9  ;;  %p3096_p2 = scmp.lt.s32.totalorder %s3090_s9, %s3090_s9 }
  0x15   :  { %519 = vmatpush1.msra.mxu1 %v3167_v3  ;;  %810 = vmatpush1.msra.mxu0 %v3184_v7 }
  0x16   :  { %2631 = vmatmul.mubr.msk.f32.gmra.mxu0 %vm65_vm1, %v40_v28  ;;  %520 = vmatprep.subr.mxu1 %v3175_v5  ;;  %p3097_p3 = por %p3096_p2, %p3095_p1 }
  0x17   :  { %185 = vmatprep.mubr.f32.mxu0 %v4484_v18  ;;  %521 = vmatpush1.msra.mxu1 %v3184_v7 }
  0x18   :  { %522 = vmatprep.subr.mxu1 %v3193_v9  ;;  %811 = vmatprep.subr.mxu0 %v3193_v9  ;;  %p3098_p4 = pnand %p3097_p3, %p3091_p0 }
  0x19   :  { %523 = vmatpush1.msra.mxu1 %v3201_v11  ;;  %812 = vmatpush1.msra.mxu0 %v3201_v11 }
  0x1a   :  { %2632 = vmatmul.mubr.msk.f32.gmra.mxu0 %vm65_vm1, %v41_v29  ;;  %524 = vmatprep.subr.mxu1 %v3210_v13  ;;  %v26_v29 = vadd.s32 128, %v25_v47 }
  0x1b   :  { %191 = vmatprep.mubr.f32.mxu0 %v4484_v18  ;;  %525 = vmatpush1.msra.mxu1 %v3220_v15 }
  0x1c   :  { %526 = vmatprep.subr.mxu1 %v3229_v17  ;;  %813 = vmatprep.subr.mxu0 %v3210_v13  ;;  %vm30_vm2 = vcmp.lt.s32.totalorder %v26_v29, 192 }
  0x1d   :  { %527 = vmatpush1.msra.mxu1 %v3235_v19  ;;  %814 = vmatpush1.msra.mxu0 %v3220_v15 }
  0x1e   :  { %2633 = vmatmul.mubr.msk.f32.gmra.mxu0 %vm65_vm1, %v42_v30  ;;  %528 = vmatprep.subr.mxu1 %v3242_v20 }
  0x1f   :  { %197 = vmatprep.mubr.f32.mxu0 %v4484_v18  ;;  %529 = vmatpush1.msra.mxu1 %v3249_v21 }
  0x20   :  { %530 = vmatprep.subr.mxu1 %v3258_v23  ;;  %815 = vmatprep.subr.mxu0 %v3229_v17 }
  0x21   :  { %531 = vmatpush1.msra.mxu1 %v3265_v24  ;;  %816 = vmatpush1.msra.mxu0 %v3235_v19 }
  0x22   :  { %2634 = vmatmul.mubr.msk.f32.gmra.mxu0 %vm65_vm1, %v43_v31  ;;  %532 = vmatprep.subr.mxu1 %v3273_v25 }
  0x23   :  { %203 = vmatprep.mubr.f32.mxu0 %v4484_v18  ;;  %533 = vmatpush1.msra.mxu1 %v3280_v26 }
  0x24   :  { %817 = vmatprep.subr.mxu0 %v3242_v20  ;;  %1096 = vmatprep.subr.mxu1 %v3158_v1 }
  0x25   :  { %818 = vmatpush1.msra.mxu0 %v3249_v21 }
  0x26   :  { %2635 = vmatmul.mubr.msk.f32.gmra.mxu0 %vm65_vm1, %v44_v32  ;;  %819 = vmatprep.subr.mxu0 %v3258_v23 }
  0x27   :  { %820 = vmatpush1.msra.mxu0 %v3265_v24  ;;  %855 = vmatprep.mubr.f32.mxu0 %v4484_v18 }
  0x28   :  { %821 = vmatprep.subr.mxu0 %v3273_v25 }
  0x29   :  { %822 = vmatpush1.msra.mxu0 %v3280_v26 }
  0x2a   :  { %1385 = vmatprep.subr.mxu0 %v3158_v1 }
  0xca   :  { %v163_v36 = vpop.f32.mrf.mxu0 }
  0xcb   :  { %v3358_v44 = vadd.f32 %v163_v36, %v3353_v40 }
  0xcc   :  { %v165_v38 = vpop.f32.mrf.mxu0 }
  0xcd   :  { %v3366_v51 = vadd.f32 %v165_v38, %v3355_v43 }
  0xce   :  { %v169_v41 = vpop.f32.mrf.mxu0 }
  0xcf   :  { %v3378_v56 = vadd.f32 %v169_v41, %v3353_v40 }
  0xd0   :  { %v171_v42 = vpop.f32.mrf.mxu0 }
  0xd1   :  { %v3384_v61 = vadd.f32 %v171_v42, %v3355_v43 }
  0xd2   :  { %v175_v45 = vpop.f32.mrf.mxu0 }
  0xd3   :  { %v3360_v46 = vpop.f32.mrf.mxu1  ;;  %v3369_v52 = vadd.f32 %v175_v45, %v3353_v40 }
  0xd4   :  { %v177_v48 = vpop.f32.mrf.mxu0  ;;  %v333_v49 = vadd.f32 %v3360_v46, %v3358_v44  ;;  %v303_v50 = vrot.slane %v3360_v46, 1  ;;  %v305_v55 = vrot.slane %v3360_v46, 2  ;;  %v307_v60 = vrot.slane %v3360_v46, 3 }
  0xd5   :  { %v3372_v53 = vadd.f32 %v177_v48, %v3355_v43  ;;  %v3374_v54 = vpop.f32.mrf.mxu1  ;;  %v309_v0 = vrot.slane %v3360_v46, 4  ;;  %v311_v37 = vrot.slane %v3360_v46, 5 }
  0xd6   :  { %v304_v57 = vrot.slane %v3374_v54, 1  ;;  %v306_v58 = vrot.slane %v3374_v54, 2  ;;  %v181_v59 = vpop.f32.mrf.mxu0  ;;  %v308_v62 = vrot.slane %v3374_v54, 3  ;;  %v334_v63 = vadd.f32 %v3374_v54, %v3366_v51 }
  0xd7   :  { %v3392_v4 = vadd.f32 %v181_v59, %v3353_v40  ;;  %2678 = vtanh.f32 %v333_v49  ;;  %v335_v8 = vadd.f32 %v303_v50, %v3378_v56  ;;  %v337_v14 = vadd.f32 %v305_v55, %v3369_v52 }
  0xd8   :  { %v338_v2 = vadd.f32 %v306_v58, %v3372_v53  ;;  %v183_v6 = vpop.f32.mrf.mxu0  ;;  %2680 = vtanh.f32 %v334_v63  ;;  %v336_v12 = vadd.f32 %v304_v57, %v3384_v61  ;;  %v310_v31 = vrot.slane %v3374_v54, 4 }
  0xd9   :  { %v3396_v10 = vadd.f32 %v183_v6, %v3355_v43  ;;  %2682 = vtanh.f32 %v335_v8  ;;  %v339_v22 = vadd.f32 %v307_v60, %v3392_v4  ;;  %v312_v39 = vrot.slane %v3374_v54, 5 }
  0xda   :  { %v187_v16 = vpop.f32.mrf.mxu0  ;;  %2684 = vtanh.f32 %v336_v12  ;;  %v313_v49 = vrot.slane %v3360_v46, 6  ;;  %v3113_v50 = vmov 0.5   ;;  %v314_v59 = vrot.slane %v3374_v54, 6 }
  0xdb   :  { %v3402_v27 = vadd.f32 %v187_v16, %v3353_v40  ;;  %v340_v28 = vadd.f32 %v308_v62, %v3396_v10  ;;  %2686 = vtanh.f32 %v337_v14  ;;  %v3426_v55 = vsel %vm30_vm2, 1.0, %v3113_v50 }
  0xdc   :  { %v189_v30 = vpop.f32.mrf.mxu0  ;;  %2688 = vtanh.f32 %v338_v2 }
  0xdd   :  { %v3407_v32 = vadd.f32 %v189_v30, %v3355_v43  ;;  %v341_v33 = vadd.f32 %v309_v0, %v3402_v27  ;;  %2690 = vtanh.f32 %v339_v22  ;;  %v3434_v0 = vsel %vm30_vm2, 0.0, %v3113_v50 }
  0xde   :  { %v193_v34 = vpop.f32.mrf.mxu0  ;;  %2692 = vtanh.f32 %v340_v28  ;;  %v316_v28 = vrot.slane %v3374_v54, 7 }
  0xdf   :  { %v3411_v35 = vadd.f32 %v193_v34, %v3353_v40  ;;  %v342_v36 = vadd.f32 %v310_v31, %v3407_v32  ;;  %2694 = vtanh.f32 %v341_v33  ;;  %v315_v33 = vrot.slane %v3360_v46, 7 }
  0xe0   :  { %v195_v38 = vpop.f32.mrf.mxu0 }
  0xe1   :  { %v3417_v41 = vadd.f32 %v195_v38, %v3355_v43  ;;  %2696 = vtanh.f32 %v342_v36  ;;  %v343_v42 = vadd.f32 %v311_v37, %v3411_v35 }
  0xe2   :  { %v199_v45 = vpop.f32.mrf.mxu0 }
  0xe3   :  { %v3421_v47 = vadd.f32 %v199_v45, %v3353_v40  ;;  %v344_v48 = vadd.f32 %v312_v39, %v3417_v41  ;;  %2698 = vtanh.f32 %v343_v42 }
  0xe4   :  { %v201_v57 = vpop.f32.mrf.mxu0  ;;  %v2679_v58 = vpop.eup %2678 }
  0xe5   :  { %4492 = vst [vmem:[#allocation5_spill] sm:$0xff] %v3421_v47  ;;  %v3430_v60 = vadd.f32 %v201_v57, %v3355_v43  ;;  %2700 = vtanh.f32 %v344_v48  ;;  %v345_v62 = vadd.f32 %v313_v49, %v3421_v47  ;;  %v2681_v63 = vpop.eup %2680  ;;  %v365_v6 = vmul.f32 0.5, %v2679_v58 }
  0xe6   :  { %v205_v2 = vpop.f32.mrf.mxu0  ;;  %v2683_v8 = vpop.eup %2682  ;;  %v366_v14 = vmul.f32 %v2681_v63, %v3426_v55 }
  0xe7   :  { %4493 = vst [vmem:[#allocation6_spill] sm:$0xff] %v3430_v60  ;;  %v3437_v12 = vadd.f32 %v205_v2, %v3353_v40  ;;  %v346_v16 = vadd.f32 %v314_v59, %v3430_v60  ;;  %2702 = vtanh.f32 %v345_v62  ;;  %v2685_v22 = vpop.eup %2684  ;;  %v3442_v31 = vadd.f32 0.5, %v365_v6 }
  0xe8   :  { %v207_v30 = vpop.f32.mrf.mxu0  ;;  %v367_v29 = vmul.f32 0.5, %v2683_v8  ;;  %v2687_v34 = vpop.eup %2686  ;;  %v3449_v40 = vadd.f32 %v366_v14, %v3434_v0  ;;  %v368_v37 = vmul.f32 %v2685_v22, %v3426_v55 }
  0xe9   :  { %v3446_v36 = vadd.f32 %v207_v30, %v3355_v43  ;;  %2704 = vtanh.f32 %v346_v16  ;;  %v2689_v38 = vpop.eup %2688  ;;  %v369_v42 = vmul.f32 0.5, %v2687_v34  ;;  %v347_v54 = vadd.f32 %v315_v33, %v3437_v12 }
  0xea   :  { %v383_v39 = vadd.f32 0.5, %v367_v29  ;;  %v2691_v45 = vpop.eup %2690  ;;  %v405_v48 = vmul.f32 %v3449_v40, %v3442_v31  ;;  %v3456_v46 = vadd.f32 %v368_v37, %v3434_v0  ;;  %v370_v43 = vmul.f32 %v2689_v38, %v3426_v55 }
  0xeb   :  { %v348_v49 = vadd.f32 %v316_v28, %v3446_v36  ;;  %v2693_v50 = vpop.eup %2692  ;;  %v371_v57 = vmul.f32 0.5, %v2691_v45  ;;  %2706 = vtanh.f32 %v347_v54  ;;  %v385_v6 = vadd.f32 0.5, %v369_v42 }
  0xec   :  { %v2695_v58 = vpop.eup %2694  ;;  %421 = vrot.lane.b32.xlu1 %v405_v48, %s3114_s3  ;;  %v406_v59 = vmul.f32 %v3456_v46, %v383_v39  ;;  %v3463_v62 = vadd.f32 %v370_v43, %v3434_v0  ;;  %v372_v63 = vmul.f32 %v2693_v50, %v3426_v55 }
  0xed   :  { %2708 = vtanh.f32 %v348_v49  ;;  %v373_v8 = vmul.f32 0.5, %v2695_v58  ;;  %v387_v14 = vadd.f32 0.5, %v371_v57 }
  0xee   :  { %v2697_v2 = vpop.eup %2696  ;;  %423 = vrot.lane.b32.xlu0 %v406_v59, %s3114_s3  ;;  %v3468_v16 = vadd.f32 %v372_v63, %v3434_v0  ;;  %v407_v30 = vmul.f32 %v3463_v62, %v385_v6 }
  0xef   :  { %v374_v22 = vmul.f32 %v2697_v2, %v3426_v55  ;;  %v389_v33 = vadd.f32 0.5, %v373_v8 }
  0xf0   :  { %v2699_v28 = vpop.eup %2698  ;;  %v408_v29 = vmul.f32 %v3468_v16, %v387_v14 }
  0xf1   :  { %v3474_v34 = vadd.f32 %v374_v22, %v3434_v0  ;;  %v375_v37 = vmul.f32 0.5, %v2699_v28 }
  0xf2   :  { %v2701_v38 = vpop.eup %2700  ;;  %425 = vrot.lane.b32.xlu0 %v407_v30, %s3114_s3  ;;  %427 = vrot.lane.b32.xlu1 %v408_v29, %s3114_s3 }
  0xf3   :  { %v409_v42 = vmul.f32 %v3474_v34, %v389_v33  ;;  %v376_v54 = vmul.f32 %v2701_v38, %v3426_v55  ;;  %v391_v48 = vadd.f32 0.5, %v375_v37 }
  0xf4   :  { %v2703_v45 = vpop.eup %2702 }
  0xf5   :  { %v3481_v43 = vadd.f32 %v376_v54, %v3434_v0  ;;  %v377_v49 = vmul.f32 0.5, %v2703_v45 }
  0xf6   :  { %v2705_v50 = vpop.eup %2704  ;;  %429 = vrot.lane.b32.xlu0 %v409_v42, %s3114_s3  ;;  %v397_v42 = vmul.f32 0.0, %v3442_v31  ;;  %v401_v31 = vmul.f32 0.0, %v389_v33 }
  0xf7   :  { %v410_v57 = vmul.f32 %v3481_v43, %v391_v48  ;;  %v378_v58 = vmul.f32 %v2705_v50, %v3426_v55  ;;  %v393_v63 = vadd.f32 0.5, %v377_v49  ;;  %v398_v49 = vmul.f32 0.0, %v383_v39 }
  0xf8   :  { %v2707_v59 = vpop.eup %2706 }
  0xf9   :  { %431 = vrot.lane.b32.xlu1 %v410_v57, %s3114_s3  ;;  %v3488_v2 = vadd.f32 %v378_v58, %v3434_v0  ;;  %v379_v22 = vmul.f32 0.5, %v2707_v59  ;;  %v399_v58 = vmul.f32 0.0, %v385_v6  ;;  %v400_v59 = vmul.f32 0.0, %v387_v14 }
  0xfa   :  { %v2709_v8 = vpop.eup %2708  ;;  %v403_v14 = vmul.f32 0.0, %v393_v63 }
  0xfb   :  { %v411_v28 = vmul.f32 %v3488_v2, %v393_v63  ;;  %v380_v30 = vmul.f32 %v2709_v8, %v3426_v55  ;;  %v395_v29 = vadd.f32 0.5, %v379_v22 }
  0xfd   :  { %433 = vrot.lane.b32.xlu0 %v411_v28, %s3114_s3  ;;  %v3494_v37 = vadd.f32 %v380_v30, %v3434_v0 }
  0xff   :  { %v412_v38 = vmul.f32 %v3494_v37, %v395_v29 }
 0x101   :  { %435 = vrot.lane.b32.xlu1 %v412_v38, %s3114_s3 }
 0x15e   :  { %v422_v54 = vpop.permute.xlu1 %421 }
 0x15f   :  { %v3499_v45 = vadd.f32 %v422_v54, %v397_v42  ;;  %v402_v42 = vmul.f32 0.0, %v391_v48 }
 0x160   :  { %v424_v50 = vpop.permute.xlu0 %423 }
 0x161   :  { %v3501_v57 = vadd.f32 %v424_v50, %v398_v49  ;;  %2710 = vtanh.f32 %v3499_v45 }
 0x163   :  { %2712 = vtanh.f32 %v3501_v57 }
 0x164   :  { %v426_v8 = vpop.permute.xlu0 %425  ;;  %v428_v22 = vpop.permute.xlu1 %427 }
 0x165   :  { %v3505_v28 = vadd.f32 %v426_v8, %v399_v58  ;;  %v3507_v30 = vadd.f32 %v428_v22, %v400_v59  ;;  %v404_v8 = vmul.f32 0.0, %v395_v29 }
 0x167   :  { %2714 = vtanh.f32 %v3505_v28 }
 0x168   :  { %2716 = vtanh.f32 %v3507_v30  ;;  %v430_v39 = vpop.permute.xlu0 %429 }
 0x169   :  { %v3511_v38 = vadd.f32 %v430_v39, %v401_v31 }
 0x16b   :  { %v432_v54 = vpop.permute.xlu1 %431  ;;  %2718 = vtanh.f32 %v3511_v38 }
 0x16c   :  { %v3514_v6 = vadd.f32 %v432_v54, %v402_v42 }
 0x16e   :  { %2720 = vtanh.f32 %v3514_v6  ;;  %v2711_v50 = vpop.eup %2710 }
 0x16f   :  { %v434_v49 = vpop.permute.xlu0 %433  ;;  %v461_v48 = vmul.f32 %v2711_v50, %v3449_v40 }
 0x170   :  { %v3517_v58 = vadd.f32 %v434_v49, %v403_v14  ;;  %v2713_v59 = vpop.eup %2712 }
 0x171   :  { %v462_v33 = vmul.f32 %v2713_v59, %v3456_v46 }
 0x172   :  { %2722 = vtanh.f32 %v3517_v58 }
 0x173   :  { %v436_v22 = vpop.permute.xlu1 %435  ;;  %v477_v31 = vrot.slane %v462_v33, 7 }
 0x174   :  { %v3522_v39 = vadd.f32 %v436_v22, %v404_v8  ;;  %v2715_v42 = vpop.eup %2714 }
 0x175   :  { %v2717_v54 = vpop.eup %2716  ;;  %v463_v63 = vmul.f32 %v2715_v42, %v3463_v62  ;;  %v479_v14 = vsel %vm478_vm3, %v477_v31, %v461_v48 }
 0x176   :  { %2724 = vtanh.f32 %v3522_v39  ;;  %v464_v46 = vmul.f32 %v2717_v54, %v3468_v16 }
 0x177   :  { %v480_v49 = vrot.slane %v463_v63, 6 }
 0x178   :  { %v2719_v29 = vpop.eup %2718  ;;  %v483_v59 = vrot.slane %v464_v46, 5 }
 0x179   :  { %v465_v40 = vmul.f32 %v2719_v29, %v3474_v34  ;;  %v482_v50 = vsel %vm481_vm4, %v480_v49, %v479_v14 }
 0x17a   :  { %v485_v8 = vsel %vm484_vm5, %v483_v59, %v482_v50 }
 0x17b   :  { %v2721_v33 = vpop.eup %2720  ;;  %v486_v22 = vrot.slane %v465_v40, 4 }
 0x17c   :  { %v466_v62 = vmul.f32 %v2721_v33, %v3481_v43 }
 0x17d   :  { %v488_v48 = vsel %vm487_vm6, %v486_v22, %v485_v8 }
 0x17e   :  { %v489_v16 = vrot.slane %v466_v62, 3 }
 0x17f   :  { %v2723_v31 = vpop.eup %2722 }
 0x180   :  { %v467_v42 = vmul.f32 %v2723_v31, %v3488_v2  ;;  %v491_v54 = vsel %vm490_vm7, %v489_v16, %v488_v48 }
 0x182   :  { %v492_v34 = vrot.slane %v467_v42, 2 }
 0x183   :  { %v2725_v63 = vpop.eup %2724 }
 0x184   :  { %v468_v14 = vmul.f32 %v2725_v63, %v3494_v37  ;;  %v494_v46 = vsel %vm493_vm8, %v492_v34, %v491_v54 }
 0x186   :  { %v495_v49 = vrot.slane %v468_v14, 1 }
 0x188   :  { %v497_v43 = vsel %vm496_vm9, %v495_v49, %v494_v46 }
 0x189   :  { %498 = vrot.lane.b32.xlu0 %v497_v43, %s3114_s3 }
 0x1fb   :  { %v499_v29 = vpop.permute.xlu0 %498 }
 0x1fc   :  { %2636 = vmatmul.mubr.msk.f32.vlgmr.msra.gmra.mxu1 %vm226_vm10, %v499_v29 }
 0x1fd   :  { %1097 = vmatpush1.msra.mxu1 %v3167_v3  ;;  %1144 = vmatprep.mubr.f32.mxu1 %v4484_v18 }
 0x1fe   :  { %1098 = vmatprep.subr.mxu1 %v3175_v5 }
 0x1ff   :  { %1099 = vmatpush1.msra.mxu1 %v3184_v7 }
 0x200   :  { %1100 = vmatprep.subr.mxu1 %v3193_v9 }
 0x201   :  { %1101 = vmatpush1.msra.mxu1 %v3201_v11 }
 0x202   :  { %1102 = vmatprep.subr.mxu1 %v3210_v13 }
 0x203   :  { %1103 = vmatpush1.msra.mxu1 %v3220_v15 }
 0x204   :  { %1104 = vmatprep.subr.mxu1 %v3229_v17 }
 0x205   :  { %1105 = vmatpush1.msra.mxu1 %v3235_v19 }
 0x206   :  { %1106 = vmatprep.subr.mxu1 %v3242_v20 }
 0x207   :  { %1107 = vmatpush1.msra.mxu1 %v3249_v21 }
 0x208   :  { %1108 = vmatprep.subr.mxu1 %v3258_v23 }
 0x209   :  { %1109 = vmatpush1.msra.mxu1 %v3265_v24 }
 0x20a   :  { %1110 = vmatprep.subr.mxu1 %v3273_v25 }
 0x20b   :  { %1111 = vmatpush1.msra.mxu1 %v3280_v26 }
 0x20c   :  { %1674 = vmatprep.subr.mxu1 %v3158_v1 }
 0x2bc   :  { %v568_v3 = vpop.f32.mrf.mxu1 }
 0x2bd   :  { %v607_v7 = vadd.f32 %v568_v3, %v3378_v56  ;;  %v577_v13 = vrot.slane %v568_v3, 1  ;;  %v575_v15 = vrot.slane %v568_v3, 7  ;;  %v579_v19 = vrot.slane %v568_v3, 2 }
 0x2be   :  { %v570_v5 = vpop.f32.mrf.mxu1  ;;  %v581_v2 = vrot.slane %v568_v3, 3  ;;  %v583_v50 = vrot.slane %v568_v3, 4  ;;  %v585_v22 = vrot.slane %v568_v3, 5  ;;  %v587_v42 = vrot.slane %v568_v3, 6 }
 0x2bf   :  { %v576_v9 = vrot.slane %v570_v5, 7  ;;  %v578_v11 = vrot.slane %v570_v5, 1  ;;  %v608_v17 = vadd.f32 %v570_v5, %v3384_v61  ;;  %v580_v20 = vrot.slane %v570_v5, 2 }
 0x2c0   :  { %v582_v23 = vrot.slane %v570_v5, 3  ;;  %v609_v1 = vadd.f32 %v577_v13, %v3369_v52  ;;  %v605_v59 = vadd.f32 %v575_v15, %v3358_v44  ;;  %v611_v40 = vadd.f32 %v579_v19, %v3392_v4 }
 0x2c1   :  { %v610_v21 = vadd.f32 %v578_v11, %v3372_v53  ;;  %2726 = vtanh.f32 %v608_v17  ;;  %v606_v37 = vadd.f32 %v576_v9, %v3366_v51  ;;  %v584_v33 = vrot.slane %v570_v5, 4 }
 0x2c2   :  { %2728 = vtanh.f32 %v607_v7  ;;  %v612_v8 = vadd.f32 %v580_v20, %v3396_v10  ;;  %v613_v62 = vadd.f32 %v581_v2, %v3402_v27  ;;  %v586_v48 = vrot.slane %v570_v5, 5 }
 0x2c3   :  { %2730 = vtanh.f32 %v610_v21  ;;  %v614_v16 = vadd.f32 %v582_v23, %v3407_v32  ;;  %v615_v31 = vadd.f32 %v583_v50, %v3411_v35  ;;  %v588_v54 = vrot.slane %v570_v5, 6 }
 0x2c4   :  { %2732 = vtanh.f32 %v609_v1  ;;  %v616_v34 = vadd.f32 %v584_v33, %v3417_v41  ;;  %v617_v63 = vadd.f32 %v585_v22, %v3421_v47  ;;  %v618_v14 = vadd.f32 %v586_v48, %v3430_v60 }
 0x2c5   :  { %2734 = vtanh.f32 %v605_v59  ;;  %v619_v46 = vadd.f32 %v587_v42, %v3437_v12  ;;  %v620_v49 = vadd.f32 %v588_v54, %v3446_v36  ;;  %v678_v17 = vrot.slane %v3501_v57, 7 }
 0x2c6   :  { %2736 = vtanh.f32 %v606_v37  ;;  %v679_v23 = vrot.slane %v3505_v28, 7 }
 0x2c7   :  { %2738 = vtanh.f32 %v611_v40 }
 0x2c8   :  { %2740 = vtanh.f32 %v612_v8 }
 0x2c9   :  { %2742 = vtanh.f32 %v613_v62  ;;  %v677_v62 = vrot.slane %v3499_v45, 7 }
 0x2ca   :  { %2744 = vtanh.f32 %v614_v16 }
 0x2cb   :  { %2746 = vtanh.f32 %v615_v31 }
 0x2cc   :  { %2748 = vtanh.f32 %v616_v34  ;;  %v680_v34 = vrot.slane %v3507_v30, 7 }
 0x2cd   :  { %2750 = vtanh.f32 %v617_v63 }
 0x2ce   :  { %v2727_v43 = vpop.eup %2726  ;;  %2752 = vtanh.f32 %v618_v14 }
 0x2cf   :  { %v2729_v29 = vpop.eup %2728  ;;  %v640_v3 = vmul.f32 %v2727_v43, %v3426_v55  ;;  %2754 = vtanh.f32 %v619_v46 }
 0x2d0   :  { %v2731_v5 = vpop.eup %2730  ;;  %v639_v7 = vmul.f32 0.5, %v2729_v29  ;;  %2756 = vtanh.f32 %v620_v49 }
 0x2d1   :  { %v2733_v9 = vpop.eup %2732  ;;  %v3575_v11 = vadd.f32 %v640_v3, %v3434_v0  ;;  %v642_v13 = vmul.f32 %v2731_v5, %v3426_v55  ;;  %v681_v5 = vrot.slane %v3511_v38, 7 }
 0x2d2   :  { %v2735_v15 = vpop.eup %2734  ;;  %v655_v19 = vadd.f32 0.5, %v639_v7  ;;  %v641_v20 = vmul.f32 0.5, %v2733_v9 }
 0x2d3   :  { %v2737_v21 = vpop.eup %2736  ;;  %v3581_v2 = vadd.f32 %v642_v13, %v3434_v0  ;;  %v637_v37 = vmul.f32 0.5, %v2735_v15 }
 0x2d4   :  { %v2739_v1 = vpop.eup %2738  ;;  %v702_v59 = vmul.f32 %v3575_v11, %v655_v19  ;;  %v657_v40 = vadd.f32 0.5, %v641_v20  ;;  %v638_v50 = vmul.f32 %v2737_v21, %v3426_v55  ;;  %v694_v33 = vmul.f32 %v678_v17, %v655_v19 }
 0x2d5   :  { %v2741_v8 = vpop.eup %2740  ;;  %v653_v57 = vadd.f32 0.5, %v637_v37  ;;  %v643_v22 = vmul.f32 0.5, %v2739_v1  ;;  %v682_v21 = vrot.slane %v3514_v6, 7 }
 0x2d6   :  { %v2743_v48 = vpop.eup %2742  ;;  %719 = vrot.lane.b32.xlu1 %v702_v59, %s3114_s3  ;;  %v703_v28 = vmul.f32 %v3581_v2, %v657_v40  ;;  %v3589_v16 = vadd.f32 %v638_v50, %v3434_v0  ;;  %v644_v31 = vmul.f32 %v2741_v8, %v3426_v55  ;;  %v695_v42 = vmul.f32 %v679_v23, %v657_v40 }
 0x2d7   :  { %v2745_v54 = vpop.eup %2744  ;;  %v659_v63 = vadd.f32 0.5, %v643_v22  ;;  %v645_v14 = vmul.f32 0.5, %v2743_v48  ;;  %v693_v46 = vmul.f32 %v677_v62, %v653_v57  ;;  %v683_v62 = vrot.slane %v3517_v58, 7 }
 0x2d8   :  { %v2747_v45 = vpop.eup %2746  ;;  %721 = vrot.lane.b32.xlu0 %v703_v28, %s3114_s3  ;;  %v701_v49 = vmul.f32 %v3589_v16, %v653_v57  ;;  %v3596_v43 = vadd.f32 %v644_v31, %v3434_v0  ;;  %v646_v29 = vmul.f32 %v2745_v54, %v3426_v55  ;;  %v684_v54 = vrot.slane %v3522_v39, 7 }
 0x2d9   :  { %v2749_v3 = vpop.eup %2748  ;;  %v661_v7 = vadd.f32 0.5, %v645_v14  ;;  %v647_v9 = vmul.f32 0.5, %v2747_v45  ;;  %v696_v13 = vmul.f32 %v680_v34, %v659_v63 }
 0x2da   :  { %v2751_v30 = vpop.eup %2750  ;;  %717 = vrot.lane.b32.xlu1 %v701_v49, %s3114_s3  ;;  %v704_v15 = vmul.f32 %v3596_v43, %v659_v63  ;;  %v3603_v17 = vadd.f32 %v646_v29, %v3434_v0  ;;  %v648_v19 = vmul.f32 %v2749_v3, %v3426_v55 }
 0x2db   :  { %v2753_v20 = vpop.eup %2752  ;;  %v663_v23 = vadd.f32 0.5, %v647_v9  ;;  %v649_v37 = vmul.f32 0.5, %v2751_v30  ;;  %v697_v1 = vmul.f32 %v681_v5, %v661_v7 }
 0x2dc   :  { %v2755_v38 = vpop.eup %2754  ;;  %723 = vrot.lane.b32.xlu0 %v704_v15, %s3114_s3  ;;  %v705_v59 = vmul.f32 %v3603_v17, %v661_v7  ;;  %v664_v40 = vadd.f32 %v648_v19, %v3434_v0  ;;  %v650_v50 = vmul.f32 %v2753_v20, %v3426_v55 }
 0x2dd   :  { %v2757_v8 = vpop.eup %2756  ;;  %v665_v57 = vadd.f32 0.5, %v649_v37  ;;  %v651_v22 = vmul.f32 0.5, %v2755_v38  ;;  %v698_v48 = vmul.f32 %v682_v21, %v663_v23 }
 0x2de   :  { %725 = vrot.lane.b32.xlu1 %v705_v59, %s3114_s3  ;;  %v706_v6 = vmul.f32 %v664_v40, %v663_v23  ;;  %v666_v28 = vadd.f32 %v650_v50, %v3434_v0  ;;  %v652_v31 = vmul.f32 %v2757_v8, %v3426_v55 }
 0x2df   :  { %v667_v34 = vadd.f32 0.5, %v651_v22  ;;  %v699_v63 = vmul.f32 %v683_v62, %v665_v57 }
 0x2e0   :  { %727 = vrot.lane.b32.xlu0 %v706_v6, %s3114_s3  ;;  %v707_v14 = vmul.f32 %v666_v28, %v665_v57  ;;  %v668_v45 = vadd.f32 %v652_v31, %v3434_v0 }
 0x2e1   :  { %v700_v58 = vmul.f32 %v684_v54, %v667_v34 }
 0x2e2   :  { %729 = vrot.lane.b32.xlu1 %v707_v14, %s3114_s3  ;;  %v708_v49 = vmul.f32 %v668_v45, %v667_v34 }
 0x2e4   :  { %731 = vrot.lane.b32.xlu0 %v708_v49, %s3114_s3 }
 0x348   :  { %v720_v29 = vpop.permute.xlu1 %719 }
 0x349   :  { %v3620_v3 = vadd.f32 %v720_v29, %v694_v33 }
 0x34a   :  { %v722_v5 = vpop.permute.xlu0 %721 }
 0x34b   :  { %v3622_v7 = vadd.f32 %v722_v5, %v695_v42 }
 0x34c   :  { %v718_v39 = vpop.permute.xlu1 %717 }
 0x34d   :  { %2758 = vtanh.f32 %v3622_v7  ;;  %v3625_v9 = vadd.f32 %v718_v39, %v693_v46 }
 0x34e   :  { %2760 = vtanh.f32 %v3620_v3  ;;  %v724_v30 = vpop.permute.xlu0 %723 }
 0x34f   :  { %2762 = vtanh.f32 %v3625_v9  ;;  %v3629_v15 = vadd.f32 %v724_v30, %v696_v13 }
 0x350   :  { %v726_v19 = vpop.permute.xlu1 %725 }
 0x351   :  { %2764 = vtanh.f32 %v3629_v15  ;;  %v3632_v33 = vadd.f32 %v726_v19, %v697_v1 }
 0x352   :  { %v728_v20 = vpop.permute.xlu0 %727 }
 0x353   :  { %2766 = vtanh.f32 %v3632_v33  ;;  %v3635_v42 = vadd.f32 %v728_v20, %v698_v48 }
 0x354   :  { %v730_v21 = vpop.permute.xlu1 %729 }
 0x355   :  { %2768 = vtanh.f32 %v3635_v42  ;;  %v3638_v46 = vadd.f32 %v730_v21, %v699_v63 }
 0x356   :  { %v732_v23 = vpop.permute.xlu0 %731 }
 0x357   :  { %2770 = vtanh.f32 %v3638_v46  ;;  %v3641_v13 = vadd.f32 %v732_v23, %v700_v58  ;;  %v3674_v23 = vld [vmem:[%s4479_s2 + $0x60] sm:$0xff] }
 0x359   :  { %2772 = vtanh.f32 %v3641_v13 }
 0x35a   :  { %v2759_v37 = vpop.eup %2758 }
 0x35b   :  { %v2761_v1 = vpop.eup %2760  ;;  %v759_v59 = vmul.f32 %v2759_v37, %v3581_v2  ;;  %v3680_v37 = vld [vmem:[%s4479_s2 + $0x58] sm:$0xff] }
 0x35c   :  { %v2763_v38 = vpop.eup %2762  ;;  %v758_v62 = vmul.f32 %v2761_v1, %v3575_v11  ;;  %v3686_v1 = vld [vmem:[%s4479_s2 + $0x50] sm:$0xff] }
 0x35d   :  { %v757_v50 = vmul.f32 %v2763_v38, %v3589_v16  ;;  %v775_v6 = vrot.slane %v759_v59, 7  ;;  %v3692_v38 = vld [vmem:[%s4479_s2 + $0x48] sm:$0xff]  ;;  %v3698_v59 = vld [vmem:[%s4479_s2 + $0x40] sm:$0xff] }
 0x35e   :  { %v2765_v8 = vpop.eup %2764 }
 0x35f   :  { %v773_v57 = vrot.slane %v757_v50, 1  ;;  %v760_v22 = vmul.f32 %v2765_v8, %v3596_v43  ;;  %v3704_v50 = vld [vmem:[%s4479_s2 + $0x38] sm:$0xff]  ;;  %v3710_v8 = vld [vmem:[%s4479_s2 + $0x30] sm:$0xff] }
 0x360   :  { %v2767_v48 = vpop.eup %2766 }
 0x361   :  { %v761_v31 = vmul.f32 %v2767_v48, %v3603_v17  ;;  %v774_v54 = vsel %vm478_vm3, %v758_v62, %v773_v57  ;;  %v777_v34 = vrot.slane %v760_v22, 6  ;;  %v3716_v62 = vld [vmem:[%s4479_s2 + $0x28] sm:$0xff]  ;;  %v3722_v57 = vld [vmem:[%s4479_s2 + $0x20] sm:$0xff]  ;;  %v3728_v22 = vld [vmem:[%s4479_s2 + $0x18] sm:$0xff] }
 0x362   :  { %v2769_v63 = vpop.eup %2768  ;;  %v776_v14 = vsel %vm481_vm4, %v775_v6, %v774_v54  ;;  %v3737_v48 = vld [vmem:[%s4479_s2 + $0x78] sm:$0xff] }
 0x363   :  { %v762_v58 = vmul.f32 %v2769_v63, %v664_v40  ;;  %v778_v2 = vsel %vm484_vm5, %v777_v34, %v776_v14  ;;  %v779_v16 = vrot.slane %v761_v31, 5 }
 0x364   :  { %v2771_v49 = vpop.eup %2770 }
 0x365   :  { %v763_v29 = vmul.f32 %v2771_v49, %v666_v28  ;;  %v780_v11 = vsel %vm487_vm6, %v779_v16, %v778_v2  ;;  %v781_v5 = vrot.slane %v762_v58, 4  ;;  %v3661_v28 = vld [vmem:[%s4479_s2 + $0x70] sm:$0xff] }
 0x366   :  { %v2773_v43 = vpop.eup %2772 }
 0x367   :  { %v764_v39 = vmul.f32 %v2773_v43, %v668_v45  ;;  %v782_v30 = vsel %vm490_vm7, %v781_v5, %v780_v11  ;;  %v783_v17 = vrot.slane %v763_v29, 3  ;;  %v3668_v45 = vld [vmem:[%s4479_s2 + $0x68] sm:$0xff] }
 0x369   :  { %v784_v19 = vsel %vm493_vm8, %v783_v17, %v782_v30  ;;  %v785_v20 = vrot.slane %v764_v39, 2 }
 0x36b   :  { %v786_v21 = vsel %vm496_vm9, %v785_v20, %v784_v19 }
 0x36c   :  { %787 = vrot.lane.b32.xlu1 %v786_v21, %s3114_s3 }
 0x3de   :  { %v788_v40 = vpop.permute.xlu1 %787 }
 0x3df   :  { %2637 = vmatmul.mubr.msk.f32.vlgmr.msra.gmra.mxu0 %vm226_vm10, %v788_v40 }
 0x3e0   :  { %1386 = vmatpush1.msra.mxu0 %v3661_v28  ;;  %1433 = vmatprep.mubr.f32.mxu0 %v4484_v18 }
 0x3e1   :  { %1387 = vmatprep.subr.mxu0 %v3668_v45 }
 0x3e2   :  { %1388 = vmatpush1.msra.mxu0 %v3674_v23 }
 0x3e3   :  { %1389 = vmatprep.subr.mxu0 %v3680_v37 }
 0x3e4   :  { %1390 = vmatpush1.msra.mxu0 %v3686_v1 }
 0x3e5   :  { %1391 = vmatprep.subr.mxu0 %v3692_v38 }
 0x3e6   :  { %1392 = vmatpush1.msra.mxu0 %v3698_v59 }
 0x3e7   :  { %1393 = vmatprep.subr.mxu0 %v3704_v50 }
 0x3e8   :  { %1394 = vmatpush1.msra.mxu0 %v3710_v8 }
 0x3e9   :  { %1395 = vmatprep.subr.mxu0 %v3716_v62 }
 0x3ea   :  { %1396 = vmatpush1.msra.mxu0 %v3722_v57 }
 0x3eb   :  { %1397 = vmatprep.subr.mxu0 %v3728_v22 }
 0x3ec   :  { %1398 = vmatpush1.msra.mxu0 %v3265_v24 }
 0x3ed   :  { %1399 = vmatprep.subr.mxu0 %v3273_v25 }
 0x3ee   :  { %1400 = vmatpush1.msra.mxu0 %v3280_v26 }
 0x3ef   :  { %1963 = vmatprep.subr.mxu0 %v3737_v48 }
 0x49f   :  { %v857_v6 = vpop.f32.mrf.mxu0 }
 0x4a0   :  { %v898_v54 = vadd.f32 %v857_v6, %v3369_v52  ;;  %v864_v14 = vrot.slane %v857_v6, 6  ;;  %v866_v58 = vrot.slane %v857_v6, 7  ;;  %v868_v25 = vrot.slane %v857_v6, 1 }
 0x4a1   :  { %v859_v31 = vpop.f32.mrf.mxu0  ;;  %v872_v49 = vrot.slane %v857_v6, 3  ;;  %v870_v39 = vrot.slane %v857_v6, 2  ;;  %v876_v20 = vrot.slane %v857_v6, 5 }
 0x4a2   :  { %v865_v34 = vrot.slane %v859_v31, 6  ;;  %v867_v63 = vrot.slane %v859_v31, 7  ;;  %v899_v24 = vadd.f32 %v859_v31, %v3372_v53  ;;  %v869_v2 = vrot.slane %v859_v31, 1 }
 0x4a3   :  { %v873_v16 = vrot.slane %v859_v31, 3  ;;  %v894_v11 = vadd.f32 %v864_v14, %v3358_v44  ;;  %v896_v5 = vadd.f32 %v866_v58, %v3378_v56  ;;  %v900_v43 = vadd.f32 %v868_v25, %v3392_v4 }
 0x4a4   :  { %v895_v26 = vadd.f32 %v865_v34, %v3366_v51  ;;  %2774 = vtanh.f32 %v899_v24  ;;  %v897_v29 = vadd.f32 %v867_v63, %v3384_v61  ;;  %v871_v30 = vrot.slane %v859_v31, 2 }
 0x4a5   :  { %2776 = vtanh.f32 %v898_v54  ;;  %v901_v17 = vadd.f32 %v869_v2, %v3396_v10  ;;  %v904_v19 = vadd.f32 %v872_v49, %v3411_v35  ;;  %v877_v21 = vrot.slane %v859_v31, 5 }
 0x4a6   :  { %2778 = vtanh.f32 %v895_v26  ;;  %v905_v40 = vadd.f32 %v873_v16, %v3417_v41  ;;  %v902_v54 = vadd.f32 %v870_v39, %v3402_v27  ;;  %v874_v34 = vrot.slane %v857_v6, 4 }
 0x4a7   :  { %2780 = vtanh.f32 %v894_v11  ;;  %v875_v63 = vrot.slane %v859_v31, 4  ;;  %v903_v14 = vadd.f32 %v871_v30, %v3407_v32  ;;  %v908_v58 = vadd.f32 %v876_v20, %v3437_v12 }
 0x4a8   :  { %2782 = vtanh.f32 %v896_v5  ;;  %v909_v24 = vadd.f32 %v877_v21, %v3446_v36  ;;  %v906_v25 = vadd.f32 %v874_v34, %v3421_v47  ;;  %v968_v39 = vrot.slane %v3622_v7, 7 }
 0x4a9   :  { %2784 = vtanh.f32 %v897_v29  ;;  %v907_v2 = vadd.f32 %v875_v63, %v3430_v60  ;;  %v966_v20 = vrot.slane %v3625_v9, 7  ;;  %v967_v7 = vrot.slane %v3620_v3, 7 }
 0x4aa   :  { %2786 = vtanh.f32 %v900_v43 }
 0x4ab   :  { %2788 = vtanh.f32 %v901_v17 }
 0x4ac   :  { %2790 = vtanh.f32 %v904_v19 }
 0x4ad   :  { %2792 = vtanh.f32 %v905_v40 }
 0x4ae   :  { %2794 = vtanh.f32 %v902_v54 }
 0x4af   :  { %2796 = vtanh.f32 %v903_v14 }
 0x4b0   :  { %2798 = vtanh.f32 %v908_v58 }
 0x4b1   :  { %v2775_v26 = vpop.eup %2774  ;;  %2800 = vtanh.f32 %v909_v24 }
 0x4b2   :  { %v2777_v6 = vpop.eup %2776  ;;  %v931_v31 = vmul.f32 %v2775_v26, %v3426_v55  ;;  %2802 = vtanh.f32 %v906_v25 }
 0x4b3   :  { %v2779_v16 = vpop.eup %2778  ;;  %v930_v49 = vmul.f32 0.5, %v2777_v6  ;;  %2804 = vtanh.f32 %v907_v2 }
 0x4b4   :  { %v2781_v29 = vpop.eup %2780  ;;  %v3758_v11 = vadd.f32 %v931_v31, %v3434_v0  ;;  %v927_v5 = vmul.f32 %v2779_v16, %v3426_v55 }
 0x4b5   :  { %v2783_v43 = vpop.eup %2782  ;;  %v946_v30 = vadd.f32 0.5, %v930_v49  ;;  %v926_v17 = vmul.f32 0.5, %v2781_v29  ;;  %v969_v29 = vrot.slane %v3629_v15, 7 }
 0x4b6   :  { %v2785_v19 = vpop.eup %2784  ;;  %v3764_v21 = vadd.f32 %v927_v5, %v3434_v0  ;;  %v928_v40 = vmul.f32 0.5, %v2783_v43 }
 0x4b7   :  { %v2787_v54 = vpop.eup %2786  ;;  %v992_v34 = vmul.f32 %v3758_v11, %v946_v30  ;;  %v942_v63 = vadd.f32 0.5, %v926_v17  ;;  %v929_v14 = vmul.f32 %v2785_v19, %v3426_v55  ;;  %v3768_v58 = vmul.f32 %v968_v39, %v946_v30 }
 0x4b8   :  { %v2789_v24 = vpop.eup %2788  ;;  %v944_v25 = vadd.f32 0.5, %v928_v40  ;;  %v932_v2 = vmul.f32 0.5, %v2787_v54  ;;  %v971_v54 = vrot.slane %v3635_v42, 7 }
 0x4b9   :  { %v2791_v26 = vpop.eup %2790  ;;  %1010 = vrot.lane.b32.xlu1 %v992_v34, %s3114_s3  ;;  %v990_v9 = vmul.f32 %v3764_v21, %v942_v63  ;;  %v3774_v6 = vadd.f32 %v929_v14, %v3434_v0  ;;  %v933_v31 = vmul.f32 %v2789_v24, %v3426_v55  ;;  %v982_v16 = vmul.f32 %v966_v20, %v942_v63 }
 0x4ba   :  { %v2793_v49 = vpop.eup %2792  ;;  %v948_v5 = vadd.f32 0.5, %v932_v2  ;;  %v936_v43 = vmul.f32 0.5, %v2791_v26  ;;  %v983_v39 = vmul.f32 %v967_v7, %v944_v25  ;;  %v970_v2 = vrot.slane %v3632_v33, 7 }
 0x4bb   :  { %v2795_v3 = vpop.eup %2794  ;;  %1006 = vrot.lane.b32.xlu0 %v990_v9, %s3114_s3  ;;  %v991_v30 = vmul.f32 %v3774_v6, %v944_v25  ;;  %v3781_v17 = vadd.f32 %v933_v31, %v3434_v0  ;;  %v937_v19 = vmul.f32 %v2793_v49, %v3426_v55 }
 0x4bc   :  { %v2797_v40 = vpop.eup %2796  ;;  %v952_v20 = vadd.f32 0.5, %v936_v43  ;;  %v934_v34 = vmul.f32 0.5, %v2795_v3  ;;  %v985_v63 = vmul.f32 %v969_v29, %v948_v5  ;;  %v973_v3 = vrot.slane %v3641_v13, 7 }
 0x4bd   :  { %v2799_v15 = vpop.eup %2798  ;;  %1008 = vrot.lane.b32.xlu1 %v991_v30, %s3114_s3  ;;  %v993_v14 = vmul.f32 %v3781_v17, %v948_v5  ;;  %v3788_v24 = vadd.f32 %v937_v19, %v3434_v0  ;;  %v935_v7 = vmul.f32 %v2797_v40, %v3426_v55 }
 0x4be   :  { %v2801_v25 = vpop.eup %2800  ;;  %v950_v26 = vadd.f32 0.5, %v934_v34  ;;  %v940_v9 = vmul.f32 0.5, %v2799_v15  ;;  %v987_v31 = vmul.f32 %v971_v54, %v952_v20  ;;  %v972_v15 = vrot.slane %v3638_v46, 7 }
 0x4bf   :  { %v2803_v42 = vpop.eup %2802  ;;  %1012 = vrot.lane.b32.xlu0 %v993_v14, %s3114_s3  ;;  %v995_v49 = vmul.f32 %v3788_v24, %v952_v20  ;;  %v951_v29 = vadd.f32 %v935_v7, %v3434_v0  ;;  %v941_v5 = vmul.f32 %v2801_v25, %v3426_v55 }
 0x4c0   :  { %v2805_v43 = vpop.eup %2804  ;;  %v956_v30 = vadd.f32 0.5, %v940_v9  ;;  %v938_v19 = vmul.f32 0.5, %v2803_v42  ;;  %v986_v40 = vmul.f32 %v970_v2, %v950_v26 }
 0x4c1   :  { %1016 = vrot.lane.b32.xlu1 %v995_v49, %s3114_s3  ;;  %v994_v33 = vmul.f32 %v951_v29, %v950_v26  ;;  %v957_v54 = vadd.f32 %v941_v5, %v3434_v0  ;;  %v939_v34 = vmul.f32 %v2805_v43, %v3426_v55 }
 0x4c2   :  { %v954_v20 = vadd.f32 0.5, %v938_v19  ;;  %v989_v14 = vmul.f32 %v973_v3, %v956_v30 }
 0x4c3   :  { %1014 = vrot.lane.b32.xlu0 %v994_v33, %s3114_s3  ;;  %v997_v7 = vmul.f32 %v957_v54, %v956_v30  ;;  %v955_v25 = vadd.f32 %v939_v34, %v3434_v0 }
 0x4c4   :  { %v988_v13 = vmul.f32 %v972_v15, %v954_v20 }
 0x4c5   :  { %1020 = vrot.lane.b32.xlu1 %v997_v7, %s3114_s3  ;;  %v996_v2 = vmul.f32 %v955_v25, %v954_v20 }
 0x4c7   :  { %1018 = vrot.lane.b32.xlu0 %v996_v2, %s3114_s3 }
 0x52b   :  { %v1011_v26 = vpop.permute.xlu1 %1010 }
 0x52c   :  { %v3808_v49 = vadd.f32 %v1011_v26, %v3768_v58 }
 0x52d   :  { %v1007_v9 = vpop.permute.xlu0 %1006 }
 0x52e   :  { %v3805_v42 = vadd.f32 %v1007_v9, %v982_v16 }
 0x52f   :  { %v1009_v46 = vpop.permute.xlu1 %1008 }
 0x530   :  { %2806 = vtanh.f32 %v3805_v42  ;;  %v3811_v5 = vadd.f32 %v1009_v46, %v983_v39 }
 0x531   :  { %v1013_v43 = vpop.permute.xlu0 %1012 }
 0x532   :  { %2808 = vtanh.f32 %v3811_v5  ;;  %v3814_v3 = vadd.f32 %v1013_v43, %v985_v63 }
 0x533   :  { %2810 = vtanh.f32 %v3808_v49  ;;  %v1017_v30 = vpop.permute.xlu1 %1016 }
 0x534   :  { %2812 = vtanh.f32 %v3814_v3  ;;  %v3818_v16 = vadd.f32 %v1017_v30, %v987_v31 }
 0x535   :  { %v1015_v19 = vpop.permute.xlu0 %1014 }
 0x536   :  { %2814 = vtanh.f32 %v3818_v16  ;;  %v3821_v58 = vadd.f32 %v1015_v19, %v986_v40 }
 0x537   :  { %v1021_v33 = vpop.permute.xlu1 %1020 }
 0x538   :  { %2816 = vtanh.f32 %v3821_v58  ;;  %v3824_v39 = vadd.f32 %v1021_v33, %v989_v14 }
 0x539   :  { %v1019_v34 = vpop.permute.xlu0 %1018 }
 0x53a   :  { %2818 = vtanh.f32 %v3824_v39  ;;  %v3827_v63 = vadd.f32 %v1019_v34, %v988_v13 }
 0x53c   :  { %2820 = vtanh.f32 %v3827_v63 }
 0x53d   :  { %v2807_v15 = vpop.eup %2806 }
 0x53e   :  { %v1046_v31 = vmul.f32 %v2807_v15, %v3764_v21 }
 0x53f   :  { %v2809_v20 = vpop.eup %2808 }
 0x540   :  { %v2811_v7 = vpop.eup %2810  ;;  %v1047_v40 = vmul.f32 %v2809_v20, %v3774_v6  ;;  %v1062_v26 = vrot.slane %v1046_v31, 2 }
 0x541   :  { %v2813_v2 = vpop.eup %2812  ;;  %v1048_v43 = vmul.f32 %v2811_v7, %v3758_v11 }
 0x542   :  { %v1063_v9 = vrot.slane %v1047_v40, 1  ;;  %v1049_v14 = vmul.f32 %v2813_v2, %v3781_v17 }
 0x543   :  { %v2815_v46 = vpop.eup %2814 }
 0x544   :  { %v1064_v13 = vsel %vm478_vm3, %v1063_v9, %v1062_v26  ;;  %v1066_v30 = vrot.slane %v1049_v14, 7  ;;  %v1051_v33 = vmul.f32 %v2815_v46, %v3788_v24  ;;  %v3872_v14 = vld [vmem:[%s4479_s2] sm:$0xff] }
 0x545   :  { %v2817_v19 = vpop.eup %2816  ;;  %v1065_v21 = vsel %vm481_vm4, %v1048_v43, %v1064_v13 }
 0x546   :  { %v1050_v34 = vmul.f32 %v2817_v19, %v951_v29  ;;  %v1067_v15 = vsel %vm484_vm5, %v1066_v30, %v1065_v21  ;;  %v1070_v18 = vrot.slane %v1051_v33, 5 }
 0x547   :  { %v2819_v6 = vpop.eup %2818 }
 0x548   :  { %v1068_v20 = vrot.slane %v1050_v34, 6  ;;  %v1053_v40 = vmul.f32 %v2819_v6, %v957_v54  ;;  %v4494_v54 = vmov 0.0  }
 0x549   :  { %v2821_v31 = vpop.eup %2820 }
 0x54a   :  { %v1052_v17 = vmul.f32 %v2821_v31, %v955_v25  ;;  %v1069_v2 = vsel %vm487_vm6, %v1068_v20, %v1067_v15  ;;  %v1074_v26 = vrot.slane %v1053_v40, 3  ;;  %v3866_v25 = vld [vmem:[%s4479_s2 + $0x8] sm:$0xff] }
 0x54b   :  { %v1071_v11 = vsel %vm490_vm7, %v1070_v18, %v1069_v2  ;;  %v3860_v18 = vld [vmem:[%s4479_s2 + $0x10] sm:$0xff] }
 0x54c   :  { %v1072_v7 = vrot.slane %v1052_v17, 4 }
 0x54e   :  { %v1073_v9 = vsel %vm493_vm8, %v1072_v7, %v1071_v11 }
 0x54f   :  { %v1075_v24 = vsel %vm496_vm9, %v1074_v26, %v1073_v9 }
 0x550   :  { %1076 = vrot.lane.b32.xlu0 %v1075_v24, %s3114_s3 }
 0x5c2   :  { %v1077_v29 = vpop.permute.xlu0 %1076 }
 0x5c3   :  { %2638 = vmatmul.mubr.msk.f32.vlgmr.msra.gmra.mxu1 %vm226_vm10, %v1077_v29 }
 0x5c4   :  { %1675 = vmatpush1.msra.mxu1 %v3661_v28  ;;  %1722 = vmatprep.mubr.f32.mxu1 %v4494_v54 }
 0x5c5   :  { %1676 = vmatprep.subr.mxu1 %v3668_v45 }
 0x5c6   :  { %1677 = vmatpush1.msra.mxu1 %v3674_v23 }
 0x5c7   :  { %1678 = vmatprep.subr.mxu1 %v3680_v37 }
 0x5c8   :  { %1679 = vmatpush1.msra.mxu1 %v3686_v1 }
 0x5c9   :  { %1680 = vmatprep.subr.mxu1 %v3692_v38 }
 0x5ca   :  { %1681 = vmatpush1.msra.mxu1 %v3698_v59 }
 0x5cb   :  { %1682 = vmatprep.subr.mxu1 %v3704_v50 }
 0x5cc   :  { %1683 = vmatpush1.msra.mxu1 %v3710_v8 }
 0x5cd   :  { %1684 = vmatprep.subr.mxu1 %v3716_v62 }
 0x5ce   :  { %1685 = vmatpush1.msra.mxu1 %v3722_v57 }
 0x5cf   :  { %1686 = vmatprep.subr.mxu1 %v3728_v22 }
 0x5d0   :  { %1687 = vmatpush1.msra.mxu1 %v3860_v18 }
 0x5d1   :  { %1688 = vmatprep.subr.mxu1 %v3866_v25 }
 0x5d2   :  { %1689 = vmatpush1.msra.mxu1 %v3872_v14 }
 0x5d3   :  { %2252 = vmatprep.subr.mxu1 %v3737_v48 }
 0x683   :  { %v1146_v46 = vpop.f32.mrf.mxu1 }
 0x684   :  { %v1189_v13 = vadd.f32 %v1146_v46, %v3392_v4  ;;  %v1155_v33 = vrot.slane %v1146_v46, 6  ;;  %v1153_v21 = vrot.slane %v1146_v46, 5  ;;  %v1159_v15 = vrot.slane %v1146_v46, 1 }
 0x685   :  { %v1148_v43 = vpop.f32.mrf.mxu1  ;;  %v1157_v40 = vrot.slane %v1146_v46, 7  ;;  %v1161_v7 = vrot.slane %v1146_v46, 2  ;;  %v1163_v29 = vrot.slane %v1146_v46, 3 }
 0x686   :  { %v1154_v30 = vrot.slane %v1148_v43, 5  ;;  %v1156_v19 = vrot.slane %v1148_v43, 6  ;;  %v1190_v34 = vadd.f32 %v1148_v43, %v3396_v10  ;;  %v1160_v6 = vrot.slane %v1148_v43, 1 }
 0x687   :  { %v1158_v31 = vrot.slane %v1148_v43, 7  ;;  %v1185_v48 = vadd.f32 %v1155_v33, %v3378_v56  ;;  %v1183_v2 = vadd.f32 %v1153_v21, %v3358_v44  ;;  %v1191_v11 = vadd.f32 %v1159_v15, %v3402_v27 }
 0x688   :  { %v1186_v20 = vadd.f32 %v1156_v19, %v3384_v61  ;;  %2822 = vtanh.f32 %v1190_v34  ;;  %v1184_v17 = vadd.f32 %v1154_v30, %v3366_v51  ;;  %v1162_v26 = vrot.slane %v1148_v43, 2 }
 0x689   :  { %2824 = vtanh.f32 %v1189_v13  ;;  %v1192_v9 = vadd.f32 %v1160_v6, %v3407_v32  ;;  %v1187_v24 = vadd.f32 %v1157_v40, %v3369_v52  ;;  %v1164_v19 = vrot.slane %v1148_v43, 3 }
 0x68a   :  { %2826 = vtanh.f32 %v1186_v20  ;;  %v1188_v30 = vadd.f32 %v1158_v31, %v3372_v53  ;;  %v1193_v13 = vadd.f32 %v1161_v7, %v3411_v35  ;;  %v1165_v33 = vrot.slane %v1146_v46, 4 }
 0x68b   :  { %2828 = vtanh.f32 %v1185_v48  ;;  %v1166_v21 = vrot.slane %v1148_v43, 4  ;;  %v1194_v34 = vadd.f32 %v1162_v26, %v3417_v41  ;;  %v1195_v15 = vadd.f32 %v1163_v29, %v3421_v47 }
 0x68c   :  { %2830 = vtanh.f32 %v1183_v2  ;;  %v1196_v6 = vadd.f32 %v1164_v19, %v3430_v60  ;;  %v1197_v20 = vadd.f32 %v1165_v33, %v3437_v12 }
 0x68d   :  { %2832 = vtanh.f32 %v1184_v17  ;;  %v1198_v31 = vadd.f32 %v1166_v21, %v3446_v36 }
 0x68e   :  { %2834 = vtanh.f32 %v1191_v11 }
 0x68f   :  { %2836 = vtanh.f32 %v1192_v9  ;;  %v1258_v9 = vrot.slane %v3814_v3, 7  ;;  %v1255_v3 = vrot.slane %v3805_v42, 7 }
 0x690   :  { %2838 = vtanh.f32 %v1187_v24 }
 0x691   :  { %2840 = vtanh.f32 %v1188_v30  ;;  %v1256_v30 = vrot.slane %v3811_v5, 7 }
 0x692   :  { %2842 = vtanh.f32 %v1193_v13 }
 0x693   :  { %2844 = vtanh.f32 %v1194_v34 }
 0x694   :  { %2846 = vtanh.f32 %v1195_v15 }
 0x695   :  { %v2823_v40 = vpop.eup %2822  ;;  %2848 = vtanh.f32 %v1196_v6 }
 0x696   :  { %v2825_v46 = vpop.eup %2824  ;;  %v1222_v43 = vmul.f32 %v2823_v40, %v3426_v55  ;;  %2850 = vtanh.f32 %v1197_v20 }
 0x697   :  { %v2827_v17 = vpop.eup %2826  ;;  %v1221_v48 = vmul.f32 0.5, %v2825_v46  ;;  %2852 = vtanh.f32 %v1198_v31 }
 0x698   :  { %v2829_v2 = vpop.eup %2828  ;;  %v3894_v11 = vadd.f32 %v1222_v43, %v3434_v0  ;;  %v1218_v7 = vmul.f32 %v2827_v17, %v3426_v55 }
 0x699   :  { %v2831_v26 = vpop.eup %2830  ;;  %v1237_v24 = vadd.f32 0.5, %v1221_v48  ;;  %v1217_v29 = vmul.f32 0.5, %v2829_v2 }
 0x69a   :  { %v2833_v19 = vpop.eup %2832  ;;  %v3900_v13 = vadd.f32 %v1218_v7, %v3434_v0  ;;  %v1215_v33 = vmul.f32 0.5, %v2831_v26  ;;  %v1259_v26 = vrot.slane %v3821_v58, 7 }
 0x69b   :  { %v2835_v21 = vpop.eup %2834  ;;  %v1282_v34 = vmul.f32 %v3894_v11, %v1237_v24  ;;  %v1233_v15 = vadd.f32 0.5, %v1217_v29  ;;  %v1216_v6 = vmul.f32 %v2833_v19, %v3426_v55  ;;  %v3904_v20 = vmul.f32 %v1258_v9, %v1237_v24 }
 0x69c   :  { %v2837_v31 = vpop.eup %2836  ;;  %v1231_v40 = vadd.f32 0.5, %v1215_v33  ;;  %v1223_v46 = vmul.f32 0.5, %v2835_v21 }
 0x69d   :  { %v2839_v43 = vpop.eup %2838  ;;  %1301 = vrot.lane.b32.xlu1 %v1282_v34, %s3114_s3  ;;  %v1280_v5 = vmul.f32 %v3900_v13, %v1233_v15  ;;  %v3910_v17 = vadd.f32 %v1216_v6, %v3434_v0  ;;  %v1224_v48 = vmul.f32 %v2837_v31, %v3426_v55  ;;  %v1272_v2 = vmul.f32 %v1256_v30, %v1233_v15 }
 0x69e   :  { %v2841_v7 = vpop.eup %2840  ;;  %v1239_v9 = vadd.f32 0.5, %v1223_v46  ;;  %v1219_v24 = vmul.f32 0.5, %v2839_v43  ;;  %v1271_v29 = vmul.f32 %v1255_v3, %v1231_v40  ;;  %v1257_v6 = vrot.slane %v3808_v49, 7 }
 0x69f   :  { %v2843_v42 = vpop.eup %2842  ;;  %1297 = vrot.lane.b32.xlu0 %v1280_v5, %s3114_s3  ;;  %v1279_v19 = vmul.f32 %v3910_v17, %v1231_v40  ;;  %v3917_v33 = vadd.f32 %v1224_v48, %v3434_v0  ;;  %v1220_v21 = vmul.f32 %v2841_v7, %v3426_v55  ;;  %v1260_v5 = vrot.slane %v3818_v16, 7 }
 0x6a0   :  { %v2845_v34 = vpop.eup %2844  ;;  %v1235_v30 = vadd.f32 0.5, %v1219_v24  ;;  %v1225_v15 = vmul.f32 0.5, %v2843_v42  ;;  %v1275_v31 = vmul.f32 %v1259_v26, %v1239_v9 }
 0x6a1   :  { %v2847_v58 = vpop.eup %2846  ;;  %1295 = vrot.lane.b32.xlu1 %v1279_v19, %s3114_s3  ;;  %v1283_v3 = vmul.f32 %v3917_v33, %v1239_v9  ;;  %v3924_v46 = vadd.f32 %v1220_v21, %v3434_v0  ;;  %v1226_v40 = vmul.f32 %v2845_v34, %v3426_v55  ;;  %v1261_v19 = vrot.slane %v3827_v63, 7 }
 0x6a2   :  { %v2849_v43 = vpop.eup %2848  ;;  %v1241_v48 = vadd.f32 0.5, %v1225_v15  ;;  %v1227_v7 = vmul.f32 0.5, %v2847_v58  ;;  %v1273_v60 = vmul.f32 %v1257_v6, %v1235_v30  ;;  %v1262_v58 = vrot.slane %v3824_v39, 7 }
 0x6a3   :  { %v2851_v49 = vpop.eup %2850  ;;  %1303 = vrot.lane.b32.xlu0 %v1283_v3, %s3114_s3  ;;  %v1281_v26 = vmul.f32 %v3924_v46, %v1235_v30  ;;  %v1242_v24 = vadd.f32 %v1226_v40, %v3434_v0  ;;  %v1228_v9 = vmul.f32 %v2849_v43, %v3426_v55 }
 0x6a4   :  { %v2853_v42 = vpop.eup %2852  ;;  %v1243_v21 = vadd.f32 0.5, %v1227_v7  ;;  %v1229_v34 = vmul.f32 0.5, %v2851_v49  ;;  %v1276_v47 = vmul.f32 %v1260_v5, %v1241_v48 }
 0x6a5   :  { %1299 = vrot.lane.b32.xlu1 %v1281_v26, %s3114_s3  ;;  %v1284_v16 = vmul.f32 %v1242_v24, %v1241_v48  ;;  %v1244_v6 = vadd.f32 %v1228_v9, %v3434_v0  ;;  %v1230_v15 = vmul.f32 %v2853_v42, %v3426_v55 }
 0x6a6   :  { %v1245_v30 = vadd.f32 0.5, %v1229_v34  ;;  %v1277_v3 = vmul.f32 %v1261_v19, %v1243_v21 }
 0x6a7   :  { %1305 = vrot.lane.b32.xlu0 %v1284_v16, %s3114_s3  ;;  %v1285_v40 = vmul.f32 %v1244_v6, %v1243_v21  ;;  %v1246_v43 = vadd.f32 %v1230_v15, %v3434_v0 }
 0x6a8   :  { %v1278_v63 = vmul.f32 %v1262_v58, %v1245_v30 }
 0x6a9   :  { %1307 = vrot.lane.b32.xlu1 %v1285_v40, %s3114_s3  ;;  %v1286_v5 = vmul.f32 %v1246_v43, %v1245_v30 }
 0x6ab   :  { %1309 = vrot.lane.b32.xlu0 %v1286_v5, %s3114_s3 }
 0x70f   :  { %v1302_v48 = vpop.permute.xlu1 %1301 }
 0x710   :  { %v3950_v19 = vadd.f32 %v1302_v48, %v3904_v20 }
 0x711   :  { %v1298_v7 = vpop.permute.xlu0 %1297 }
 0x712   :  { %v3941_v49 = vadd.f32 %v1298_v7, %v1272_v2 }
 0x713   :  { %v1296_v26 = vpop.permute.xlu1 %1295 }
 0x714   :  { %2854 = vtanh.f32 %v3941_v49  ;;  %v3944_v39 = vadd.f32 %v1296_v26, %v1271_v29 }
 0x715   :  { %v1304_v9 = vpop.permute.xlu0 %1303 }
 0x716   :  { %2856 = vtanh.f32 %v3944_v39  ;;  %v3947_v42 = vadd.f32 %v1304_v9, %v1275_v31 }
 0x717   :  { %v1300_v21 = vpop.permute.xlu1 %1299 }
 0x718   :  { %2858 = vtanh.f32 %v3947_v42  ;;  %v3953_v34 = vadd.f32 %v1300_v21, %v1273_v60 }
 0x719   :  { %v1306_v2 = vpop.permute.xlu0 %1305 }
 0x71a   :  { %2860 = vtanh.f32 %v3953_v34  ;;  %v3956_v16 = vadd.f32 %v1306_v2, %v1276_v47 }
 0x71b   :  { %2862 = vtanh.f32 %v3950_v19  ;;  %v1308_v29 = vpop.permute.xlu1 %1307 }
 0x71c   :  { %2864 = vtanh.f32 %v3956_v16  ;;  %v3960_v31 = vadd.f32 %v1308_v29, %v1277_v3 }
 0x71d   :  { %v1310_v15 = vpop.permute.xlu0 %1309 }
 0x71e   :  { %4495 = vst [vmem:[#allocation7_spill] sm:$0xff] %v3960_v31  ;;  %2866 = vtanh.f32 %v3960_v31  ;;  %v3963_v20 = vadd.f32 %v1310_v15, %v1278_v63 }
 0x720   :  { %4496 = vst [vmem:[#allocation8_spill] sm:$0xff] %v3963_v20  ;;  %2868 = vtanh.f32 %v3963_v20 }
 0x721   :  { %v2855_v60 = vpop.eup %2854 }
 0x722   :  { %v1336_v58 = vmul.f32 %v2855_v60, %v3900_v13 }
 0x723   :  { %v2857_v30 = vpop.eup %2856 }
 0x724   :  { %v1335_v47 = vmul.f32 %v2857_v30, %v3910_v17  ;;  %v1352_v5 = vrot.slane %v1336_v58, 2 }
 0x725   :  { %v2859_v40 = vpop.eup %2858 }
 0x726   :  { %v1351_v48 = vrot.slane %v1335_v47, 3  ;;  %v1339_v9 = vmul.f32 %v2859_v40, %v3917_v33 }
 0x727   :  { %v2861_v7 = vpop.eup %2860 }
 0x728   :  { %v2863_v26 = vpop.eup %2862  ;;  %v1337_v3 = vmul.f32 %v2861_v7, %v3924_v46  ;;  %v1353_v63 = vsel %vm478_vm3, %v1352_v5, %v1351_v48  ;;  %v1357_v30 = vrot.slane %v1339_v9, 7 }
 0x729   :  { %v2865_v21 = vpop.eup %2864  ;;  %v1338_v13 = vmul.f32 %v2863_v26, %v3894_v11 }
 0x72a   :  { %v1354_v2 = vrot.slane %v1337_v3, 1  ;;  %v1340_v29 = vmul.f32 %v2865_v21, %v1242_v24 }
 0x72b   :  { %v2867_v15 = vpop.eup %2866 }
 0x72c   :  { %v1341_v60 = vmul.f32 %v2867_v15, %v1244_v6  ;;  %v1355_v17 = vsel %vm481_vm4, %v1354_v2, %v1353_v63  ;;  %v1359_v58 = vrot.slane %v1340_v29, 6 }
 0x72d   :  { %v2869_v47 = vpop.eup %2868  ;;  %v1356_v31 = vsel %vm484_vm5, %v1338_v13, %v1355_v17 }
 0x72e   :  { %v1342_v20 = vmul.f32 %v2869_v47, %v1246_v43  ;;  %v1358_v46 = vsel %vm487_vm6, %v1357_v30, %v1356_v31  ;;  %v1361_v33 = vrot.slane %v1341_v60, 5  ;;  %v4497_v47 = vld [vmem:[#allocation5_spill] sm:$0xff] }
 0x72f   :  { %v1360_v40 = vsel %vm490_vm7, %v1359_v58, %v1358_v46 }
 0x730   :  { %v1362_v5 = vsel %vm493_vm8, %v1361_v33, %v1360_v40  ;;  %v1363_v24 = vrot.slane %v1342_v20, 4  ;;  %v4498_v33 = vld [vmem:[#allocation6_spill] sm:$0xff] }
 0x732   :  { %v1364_v48 = vsel %vm496_vm9, %v1363_v24, %v1362_v5 }
 0x733   :  { %1365 = vrot.lane.b32.xlu1 %v1364_v48, %s3114_s3 }
 0x7a5   :  { %v1366_v11 = vpop.permute.xlu1 %1365 }
 0x7a6   :  { %2639 = vmatmul.mubr.msk.f32.vlgmr.msra.gmra.mxu0 %vm226_vm10, %v1366_v11 }
 0x7a7   :  { %1964 = vmatpush1.msra.mxu0 %v3661_v28  ;;  %2011 = vmatprep.mubr.f32.mxu0 %v4494_v54 }
 0x7a8   :  { %1965 = vmatprep.subr.mxu0 %v3668_v45 }
 0x7a9   :  { %1966 = vmatpush1.msra.mxu0 %v3674_v23 }
 0x7aa   :  { %1967 = vmatprep.subr.mxu0 %v3680_v37 }
 0x7ab   :  { %1968 = vmatpush1.msra.mxu0 %v3686_v1 }
 0x7ac   :  { %1969 = vmatprep.subr.mxu0 %v3692_v38 }
 0x7ad   :  { %1970 = vmatpush1.msra.mxu0 %v3698_v59 }
 0x7ae   :  { %1971 = vmatprep.subr.mxu0 %v3704_v50 }
 0x7af   :  { %1972 = vmatpush1.msra.mxu0 %v3710_v8 }
 0x7b0   :  { %1973 = vmatprep.subr.mxu0 %v3716_v62 }
 0x7b1   :  { %1974 = vmatpush1.msra.mxu0 %v3722_v57 }
 0x7b2   :  { %1975 = vmatprep.subr.mxu0 %v3728_v22 }
 0x7b3   :  { %1976 = vmatpush1.msra.mxu0 %v3860_v18 }
 0x7b4   :  { %1977 = vmatprep.subr.mxu0 %v3866_v25 }
 0x7b5   :  { %1978 = vmatpush1.msra.mxu0 %v3872_v14 }
 0x7b6   :  { %2654 = vmatprep.subr.mxu0 %v4494_v54 }
 0x866   :  { %v1435_v28 = vpop.f32.mrf.mxu0 }
 0x867   :  { %v1480_v23 = vadd.f32 %v1435_v28, %v3402_v27  ;;  %v1442_v38 = vrot.slane %v1435_v28, 4  ;;  %v1444_v59 = vrot.slane %v1435_v28, 5  ;;  %v1446_v8 = vrot.slane %v1435_v28, 6 }
 0x868   :  { %v1437_v45 = vpop.f32.mrf.mxu0  ;;  %v1448_v6 = vrot.slane %v1435_v28, 7  ;;  %v1450_v26 = vrot.slane %v1435_v28, 1  ;;  %v1454_v21 = vrot.slane %v1435_v28, 3  ;;  %v1452_v13 = vrot.slane %v1435_v28, 2 }
 0x869   :  { %v1443_v37 = vrot.slane %v1437_v45, 4  ;;  %v1445_v1 = vrot.slane %v1437_v45, 5  ;;  %v1481_v50 = vadd.f32 %v1437_v45, %v3407_v32  ;;  %v1447_v62 = vrot.slane %v1437_v45, 6 }
 0x86a   :  { %v1449_v22 = vrot.slane %v1437_v45, 7  ;;  %v1472_v31 = vadd.f32 %v1442_v38, %v3358_v44  ;;  %v1474_v20 = vadd.f32 %v1444_v59, %v3378_v56  ;;  %v1476_v7 = vadd.f32 %v1446_v8, %v3369_v52 }
 0x86b   :  { %v1473_v57 = vadd.f32 %v1443_v37, %v3366_v51  ;;  %2870 = vtanh.f32 %v1481_v50  ;;  %v1475_v43 = vadd.f32 %v1445_v1, %v3384_v61  ;;  %v1451_v3 = vrot.slane %v1437_v45, 1 }
 0x86c   :  { %2872 = vtanh.f32 %v1480_v23  ;;  %v1477_v9 = vadd.f32 %v1447_v62, %v3372_v53  ;;  %v1478_v63 = vadd.f32 %v1448_v6, %v3392_v4  ;;  %v1455_v2 = vrot.slane %v1437_v45, 3 }
 0x86d   :  { %2874 = vtanh.f32 %v1473_v57  ;;  %v1479_v29 = vadd.f32 %v1449_v22, %v3396_v10  ;;  %v1482_v15 = vadd.f32 %v1450_v26, %v3411_v35  ;;  %v1453_v60 = vrot.slane %v1437_v45, 2 }
 0x86e   :  { %2876 = vtanh.f32 %v1472_v31  ;;  %v1483_v17 = vadd.f32 %v1451_v3, %v3417_v41  ;;  %v1486_v30 = vadd.f32 %v1454_v21, %v3437_v12  ;;  %v1487_v58 = vadd.f32 %v1455_v2, %v3446_v36 }
 0x86f   :  { %2878 = vtanh.f32 %v1474_v20  ;;  %v1484_v46 = vadd.f32 %v1452_v13, %v4497_v47  ;;  %v1485_v40 = vadd.f32 %v1453_v60, %v4498_v33  ;;  %v1548_v38 = vrot.slane %v3947_v42, 7 }
 0x870   :  { %2880 = vtanh.f32 %v1475_v43  ;;  %v1544_v62 = vrot.slane %v3944_v39, 7  ;;  %v1545_v42 = vrot.slane %v3941_v49, 7  ;;  %v1546_v13 = vrot.slane %v3953_v34, 7 }
 0x871   :  { %2882 = vtanh.f32 %v1476_v7 }
 0x872   :  { %2884 = vtanh.f32 %v1477_v9 }
 0x873   :  { %2886 = vtanh.f32 %v1478_v63 }
 0x874   :  { %2888 = vtanh.f32 %v1479_v29 }
 0x875   :  { %2890 = vtanh.f32 %v1482_v15 }
 0x876   :  { %2892 = vtanh.f32 %v1483_v17 }
 0x877   :  { %2894 = vtanh.f32 %v1486_v30 }
 0x878   :  { %v2871_v5 = vpop.eup %2870  ;;  %2896 = vtanh.f32 %v1487_v58 }
 0x879   :  { %v2873_v24 = vpop.eup %2872  ;;  %v1513_v48 = vmul.f32 %v2871_v5, %v3426_v55  ;;  %2898 = vtanh.f32 %v1484_v46 }
 0x87a   :  { %v2875_v11 = vpop.eup %2874  ;;  %v1512_v28 = vmul.f32 0.5, %v2873_v24  ;;  %2900 = vtanh.f32 %v1485_v40  ;;  %v1547_v24 = vrot.slane %v3950_v19, 7 }
 0x87b   :  { %v2877_v45 = vpop.eup %2876  ;;  %v4015_v23 = vadd.f32 %v1513_v48, %v3434_v0  ;;  %v1505_v37 = vmul.f32 %v2875_v11, %v3426_v55 }
 0x87c   :  { %v2879_v1 = vpop.eup %2878  ;;  %v1528_v59 = vadd.f32 0.5, %v1512_v28  ;;  %v1504_v50 = vmul.f32 0.5, %v2877_v45 }
 0x87d   :  { %v2881_v8 = vpop.eup %2880  ;;  %v4021_v57 = vadd.f32 %v1505_v37, %v3434_v0  ;;  %v1506_v22 = vmul.f32 0.5, %v2879_v1 }
 0x87e   :  { %v2883_v6 = vpop.eup %2882  ;;  %v1572_v43 = vmul.f32 %v4015_v23, %v1528_v59  ;;  %v1520_v31 = vadd.f32 0.5, %v1504_v50  ;;  %v1507_v20 = vmul.f32 %v2881_v8, %v3426_v55  ;;  %v4025_v7 = vmul.f32 %v1548_v38, %v1528_v59 }
 0x87f   :  { %v2885_v26 = vpop.eup %2884  ;;  %v1522_v3 = vadd.f32 0.5, %v1506_v22  ;;  %v1508_v9 = vmul.f32 0.5, %v2883_v6  ;;  %v1549_v59 = vrot.slane %v3956_v16, 7 }
 0x880   :  { %v2887_v63 = vpop.eup %2886  ;;  %1592 = vrot.lane.b32.xlu1 %v1572_v43, %s3114_s3  ;;  %v1568_v39 = vmul.f32 %v4021_v57, %v1520_v31  ;;  %v4031_v21 = vadd.f32 %v1507_v20, %v3434_v0  ;;  %v1509_v2 = vmul.f32 %v2885_v26, %v3426_v55  ;;  %v1560_v29 = vmul.f32 %v1544_v62, %v1520_v31  ;;  %v4499_v20 = vld [vmem:[#allocation8_spill] sm:$0xff] }
 0x881   :  { %v2889_v15 = vpop.eup %2888  ;;  %v1524_v60 = vadd.f32 0.5, %v1508_v9  ;;  %v1510_v17 = vmul.f32 0.5, %v2887_v63  ;;  %v1561_v30 = vmul.f32 %v1545_v42, %v1522_v3  ;;  %v1551_v26 = vrot.slane %v4499_v20, 7 }
 0x882   :  { %v2891_v49 = vpop.eup %2890  ;;  %1584 = vrot.lane.b32.xlu0 %v1568_v39, %s3114_s3  ;;  %v1569_v58 = vmul.f32 %v4031_v21, %v1522_v3  ;;  %v4038_v46 = vadd.f32 %v1509_v2, %v3434_v0  ;;  %v1511_v40 = vmul.f32 %v2889_v15, %v3426_v55  ;;  %v4500_v2 = vld [vmem:[#allocation7_spill] sm:$0xff] }
 0x883   :  { %v2893_v5 = vpop.eup %2892  ;;  %v1526_v48 = vadd.f32 0.5, %v1510_v17  ;;  %v1514_v11 = vmul.f32 0.5, %v2891_v49  ;;  %v1562_v28 = vmul.f32 %v1546_v13, %v1524_v60  ;;  %v1550_v15 = vrot.slane %v4500_v2, 7 }
 0x884   :  { %v2895_v34 = vpop.eup %2894  ;;  %1586 = vrot.lane.b32.xlu1 %v1569_v58, %s3114_s3  ;;  %v1570_v45 = vmul.f32 %v4038_v46, %v1524_v60  ;;  %v4045_v37 = vadd.f32 %v1511_v40, %v3434_v0  ;;  %v1515_v1 = vmul.f32 %v2893_v5, %v3426_v55 }
 0x885   :  { %v2897_v38 = vpop.eup %2896  ;;  %v1530_v50 = vadd.f32 0.5, %v1514_v11  ;;  %v1518_v8 = vmul.f32 0.5, %v2895_v34  ;;  %v1563_v62 = vmul.f32 %v1547_v24, %v1526_v48 }
 0x886   :  { %v2899_v19 = vpop.eup %2898  ;;  %1588 = vrot.lane.b32.xlu0 %v1570_v45, %s3114_s3  ;;  %v1571_v22 = vmul.f32 %v4045_v37, %v1526_v48  ;;  %v1531_v6 = vadd.f32 %v1515_v1, %v3434_v0  ;;  %v1519_v43 = vmul.f32 %v2897_v38, %v3426_v55 }
 0x887   :  { %v2901_v31 = vpop.eup %2900  ;;  %v1534_v42 = vadd.f32 0.5, %v1518_v8  ;;  %v1516_v3 = vmul.f32 0.5, %v2899_v19  ;;  %v1565_v9 = vmul.f32 %v1549_v59, %v1530_v50 }
 0x888   :  { %1590 = vrot.lane.b32.xlu1 %v1571_v22, %s3114_s3  ;;  %v1573_v16 = vmul.f32 %v1531_v6, %v1530_v50  ;;  %v1535_v63 = vadd.f32 %v1519_v43, %v3434_v0  ;;  %v1517_v39 = vmul.f32 %v2901_v31, %v3426_v55 }
 0x889   :  { %v1532_v13 = vadd.f32 0.5, %v1516_v3  ;;  %v1567_v60 = vmul.f32 %v1551_v26, %v1534_v42 }
 0x88a   :  { %1594 = vrot.lane.b32.xlu0 %v1573_v16, %s3114_s3  ;;  %v1575_v17 = vmul.f32 %v1535_v63, %v1534_v42  ;;  %v1533_v49 = vadd.f32 %v1517_v39, %v3434_v0 }
 0x88b   :  { %v1566_v58 = vmul.f32 %v1550_v15, %v1532_v13 }
 0x88c   :  { %1598 = vrot.lane.b32.xlu1 %v1575_v17, %s3114_s3  ;;  %v1574_v40 = vmul.f32 %v1533_v49, %v1532_v13 }
 0x88e   :  { %1596 = vrot.lane.b32.xlu0 %v1574_v40, %s3114_s3 }
 0x8f2   :  { %v1593_v5 = vpop.permute.xlu1 %1592 }
 0x8f3   :  { %v4071_v38 = vadd.f32 %v1593_v5, %v4025_v7 }
 0x8f4   :  { %v1585_v24 = vpop.permute.xlu0 %1584 }
 0x8f5   :  { %v4062_v48 = vadd.f32 %v1585_v24, %v1560_v29 }
 0x8f6   :  { %v1587_v11 = vpop.permute.xlu1 %1586 }
 0x8f7   :  { %2902 = vtanh.f32 %v4062_v48  ;;  %v4065_v34 = vadd.f32 %v1587_v11, %v1561_v30 }
 0x8f8   :  { %v1589_v45 = vpop.permute.xlu0 %1588 }
 0x8f9   :  { %2904 = vtanh.f32 %v4065_v34  ;;  %v4068_v1 = vadd.f32 %v1589_v45, %v1562_v28 }
 0x8fa   :  { %v1591_v59 = vpop.permute.xlu1 %1590 }
 0x8fb   :  { %2906 = vtanh.f32 %v4068_v1  ;;  %v4074_v50 = vadd.f32 %v1591_v59, %v1563_v62 }
 0x8fc   :  { %v1595_v29 = vpop.permute.xlu0 %1594 }
 0x8fd   :  { %2908 = vtanh.f32 %v4074_v50  ;;  %v4077_v8 = vadd.f32 %v1595_v29, %v1565_v9 }
 0x8fe   :  { %2910 = vtanh.f32 %v4071_v38  ;;  %v1599_v30 = vpop.permute.xlu1 %1598 }
 0x8ff   :  { %2912 = vtanh.f32 %v4077_v8  ;;  %v4081_v28 = vadd.f32 %v1599_v30, %v1567_v60 }
 0x900   :  { %v1597_v19 = vpop.permute.xlu0 %1596 }
 0x901   :  { %2914 = vtanh.f32 %v4081_v28  ;;  %v4084_v7 = vadd.f32 %v1597_v19, %v1566_v58 }
 0x903   :  { %2916 = vtanh.f32 %v4084_v7 }
 0x904   :  { %v2903_v62 = vpop.eup %2902 }
 0x905   :  { %v1624_v22 = vmul.f32 %v2903_v62, %v4021_v57  ;;  %v3081_v62 = vld [vmem:[%s4479_s2 + $0x58] sm:$0xff] }
 0x906   :  { %v2905_v43 = vpop.eup %2904 }
 0x907   :  { %v1625_v31 = vmul.f32 %v2905_v43, %v4031_v21  ;;  %v1640_v26 = vrot.slane %v1624_v22, 4  ;;  %v3082_v22 = vld [vmem:[%s4479_s2 + $0x50] sm:$0xff]  ;;  %v3083_v43 = vld [vmem:[%s4479_s2 + $0x48] sm:$0xff] }
 0x908   :  { %v2907_v20 = vpop.eup %2906 }
 0x909   :  { %v1641_v42 = vrot.slane %v1625_v31, 3  ;;  %v1626_v3 = vmul.f32 %v2907_v20, %v4038_v46  ;;  %v3084_v31 = vld [vmem:[%s4479_s2 + $0x40] sm:$0xff]  ;;  %v3085_v20 = vld [vmem:[%s4479_s2 + $0x38] sm:$0xff] }
 0x90a   :  { %v2909_v9 = vpop.eup %2908 }
 0x90b   :  { %v2911_v16 = vpop.eup %2910  ;;  %v1643_v39 = vrot.slane %v1626_v3, 2  ;;  %v1627_v2 = vmul.f32 %v2909_v9, %v4045_v37  ;;  %v1642_v15 = vsel %vm478_vm3, %v1641_v42, %v1640_v26  ;;  %v3086_v26 = vld [vmem:[%s4479_s2 + $0x30] sm:$0xff]  ;;  %v3087_v42 = vld [vmem:[%s4479_s2 + $0x28] sm:$0xff]  ;;  %v3088_v3 = vld [vmem:[%s4479_s2 + $0x20] sm:$0xff] }
 0x90c   :  { %v2913_v13 = vpop.eup %2912  ;;  %v1628_v21 = vmul.f32 %v2911_v16, %v4015_v23  ;;  %v3078_v23 = vld [vmem:[%s4479_s2 + $0x70] sm:$0xff]  ;;  %v3089_v9 = vld [vmem:[%s4479_s2 + $0x18] sm:$0xff] }
 0x90d   :  { %v1629_v60 = vmul.f32 %v2913_v13, %v1531_v6  ;;  %v1644_v17 = vsel %vm481_vm4, %v1643_v39, %v1642_v15  ;;  %v1645_v57 = vrot.slane %v1627_v2, 1 }
 0x90e   :  { %v2915_v58 = vpop.eup %2914 }
 0x90f   :  { %v1646_v40 = vsel %vm484_vm5, %v1645_v57, %v1644_v17  ;;  %v1648_v5 = vrot.slane %v1629_v60, 7  ;;  %v1631_v46 = vmul.f32 %v2915_v58, %v1535_v63  ;;  %v3079_v63 = vld [vmem:[%s4479_s2 + $0x68] sm:$0xff] }
 0x910   :  { %v2917_v24 = vpop.eup %2916  ;;  %v1647_v11 = vsel %vm487_vm6, %v1628_v21, %v1646_v40 }
 0x911   :  { %v1630_v45 = vmul.f32 %v2917_v24, %v1533_v49  ;;  %v1649_v37 = vsel %vm490_vm7, %v1648_v5, %v1647_v11  ;;  %v1652_v29 = vrot.slane %v1631_v46, 5  ;;  %v3080_v49 = vld [vmem:[%s4479_s2 + $0x60] sm:$0xff] }
 0x913   :  { %v1650_v59 = vrot.slane %v1630_v45, 6 }
 0x915   :  { %v1651_v6 = vsel %vm493_vm8, %v1650_v59, %v1649_v37 }
 0x916   :  { %v1653_v30 = vsel %vm496_vm9, %v1652_v29, %v1651_v6 }
 0x917   :  { %1654 = vrot.lane.b32.xlu0 %v1653_v30, %s3114_s3 }
 0x989   :  { %v1655_v19 = vpop.permute.xlu0 %1654 }
 0x98a   :  { %2640 = vmatmul.mubr.msk.f32.vlgmr.msra.gmra.mxu1 %vm226_vm10, %v1655_v19 }
 0x98b   :  { %2253 = vmatpush1.msra.mxu1 %v3078_v23  ;;  %2300 = vmatprep.mubr.f32.mxu1 %v4494_v54 }
 0x98c   :  { %2254 = vmatprep.subr.mxu1 %v3079_v63 }
 0x98d   :  { %2255 = vmatpush1.msra.mxu1 %v3080_v49 }
 0x98e   :  { %2256 = vmatprep.subr.mxu1 %v3081_v62 }
 0x98f   :  { %2257 = vmatpush1.msra.mxu1 %v3082_v22 }
 0x990   :  { %2258 = vmatprep.subr.mxu1 %v3083_v43 }
 0x991   :  { %2259 = vmatpush1.msra.mxu1 %v3084_v31 }
 0x992   :  { %2260 = vmatprep.subr.mxu1 %v3085_v20 }
 0x993   :  { %2261 = vmatpush1.msra.mxu1 %v3086_v26 }
 0x994   :  { %2262 = vmatprep.subr.mxu1 %v3087_v42 }
 0x995   :  { %2263 = vmatpush1.msra.mxu1 %v3088_v3 }
 0x996   :  { %2264 = vmatprep.subr.mxu1 %v3089_v9 }
 0x997   :  { %2265 = vmatpush1.msra.mxu1 %v3860_v18 }
 0x998   :  { %2266 = vmatprep.subr.mxu1 %v3866_v25 }
 0x999   :  { %2267 = vmatpush1.msra.mxu1 %v3872_v14 }
 0xa4a   :  { %v1724_v16 = vpop.f32.mrf.mxu1 }
 0xa4b   :  { %v1733_v2 = vrot.slane %v1724_v16, 4  ;;  %v1731_v60 = vrot.slane %v1724_v16, 3  ;;  %v1737_v17 = vrot.slane %v1724_v16, 6  ;;  %v1735_v5 = vrot.slane %v1724_v16, 5 }
 0xa4c   :  { %v1726_v39 = vpop.f32.mrf.mxu1  ;;  %v1741_v25 = vrot.slane %v1724_v16, 1  ;;  %v1739_v59 = vrot.slane %v1724_v16, 7  ;;  %v1743_v19 = vrot.slane %v1724_v16, 2  ;;  %v1771_v31 = vadd.f32 %v1724_v16, %v3411_v35 }
 0xa4d   :  { %v1732_v15 = vrot.slane %v1726_v39, 3  ;;  %v1734_v13 = vrot.slane %v1726_v39, 4  ;;  %v1738_v57 = vrot.slane %v1726_v39, 6  ;;  %v1772_v58 = vadd.f32 %v1726_v39, %v3417_v41 }
 0xa4e   :  { %v1736_v18 = vrot.slane %v1726_v39, 5  ;;  %v1763_v14 = vadd.f32 %v1733_v2, %v3378_v56  ;;  %v1761_v24 = vadd.f32 %v1731_v60, %v3358_v44  ;;  %v1767_v46 = vadd.f32 %v1737_v17, %v3392_v4 }
 0xa4f   :  { %v1762_v21 = vadd.f32 %v1732_v15, %v3366_v51  ;;  %v1764_v40 = vadd.f32 %v1734_v13, %v3384_v61  ;;  %2918 = vtanh.f32 %v1772_v58  ;;  %v1742_v11 = vrot.slane %v1726_v39, 1 }
 0xa50   :  { %v1768_v45 = vadd.f32 %v1738_v57, %v3396_v10  ;;  %v1765_v37 = vadd.f32 %v1735_v5, %v3369_v52  ;;  %v1740_v29 = vrot.slane %v1726_v39, 7  ;;  %v1766_v6 = vadd.f32 %v1736_v18, %v3372_v53 }
 0xa51   :  { %2920 = vtanh.f32 %v1764_v40  ;;  %v1773_v30 = vadd.f32 %v1741_v25, %v4497_v47  ;;  %v1744_v23 = vrot.slane %v1726_v39, 2  ;;  %v1774_v63 = vadd.f32 %v1742_v11, %v4498_v33 }
 0xa52   :  { %2922 = vtanh.f32 %v1762_v21  ;;  %v1769_v49 = vadd.f32 %v1739_v59, %v3402_v27  ;;  %v1770_v62 = vadd.f32 %v1740_v29, %v3407_v32  ;;  %v1775_v22 = vadd.f32 %v1743_v19, %v3437_v12 }
 0xa53   :  { %2924 = vtanh.f32 %v1763_v14  ;;  %v1776_v43 = vadd.f32 %v1744_v23, %v3446_v36  ;;  %v1834_v58 = vrot.slane %v4065_v34, 7  ;;  %v1833_v18 = vrot.slane %v4062_v48, 7 }
 0xa54   :  { %2926 = vtanh.f32 %v1761_v24  ;;  %v1836_v25 = vrot.slane %v4074_v50, 7  ;;  %v1835_v50 = vrot.slane %v4068_v1, 7 }
 0xa55   :  { %2928 = vtanh.f32 %v1767_v46 }
 0xa56   :  { %2930 = vtanh.f32 %v1768_v45 }
 0xa57   :  { %2932 = vtanh.f32 %v1765_v37 }
 0xa58   :  { %2934 = vtanh.f32 %v1766_v6 }
 0xa59   :  { %2936 = vtanh.f32 %v1773_v30 }
 0xa5a   :  { %2938 = vtanh.f32 %v1774_v63 }
 0xa5b   :  { %2940 = vtanh.f32 %v1769_v49 }
 0xa5c   :  { %2942 = vtanh.f32 %v1770_v62  ;;  %v2919_v20 = vpop.eup %2918 }
 0xa5d   :  { %2944 = vtanh.f32 %v1775_v22  ;;  %v1839_v22 = vrot.slane %v4084_v7, 7 }
 0xa5e   :  { %v2921_v26 = vpop.eup %2920  ;;  %2946 = vtanh.f32 %v1776_v43 }
 0xa5f   :  { %v2923_v42 = vpop.eup %2922  ;;  %v1796_v3 = vmul.f32 %v2921_v26, %v3426_v55  ;;  %2948 = vtanh.f32 %v1771_v31 }
 0xa60   :  { %v2925_v9 = vpop.eup %2924  ;;  %v1794_v39 = vmul.f32 %v2923_v42, %v3426_v55 }
 0xa61   :  { %v2927_v2 = vpop.eup %2926  ;;  %v1795_v15 = vmul.f32 0.5, %v2925_v9  ;;  %v4160_v13 = vadd.f32 %v1796_v3, %v3434_v0 }
 0xa62   :  { %v2929_v60 = vpop.eup %2928  ;;  %v1793_v17 = vmul.f32 0.5, %v2927_v2  ;;  %v4163_v16 = vadd.f32 %v1794_v39, %v3434_v0 }
 0xa63   :  { %v2931_v57 = vpop.eup %2930  ;;  %v1811_v21 = vadd.f32 0.5, %v1795_v15  ;;  %v1799_v40 = vmul.f32 0.5, %v2929_v60  ;;  %v1804_v60 = vmul.f32 %v2919_v20, %v3426_v55 }
 0xa64   :  { %v2933_v5 = vpop.eup %2932  ;;  %v1809_v14 = vadd.f32 0.5, %v1793_v17  ;;  %v1800_v24 = vmul.f32 %v2931_v57, %v3426_v55  ;;  %v1837_v57 = vrot.slane %v4071_v38, 7 }
 0xa65   :  { %v2935_v46 = vpop.eup %2934  ;;  %v1858_v11 = vmul.f32 %v4160_v13, %v1811_v21  ;;  %v1815_v45 = vadd.f32 0.5, %v1799_v40  ;;  %v1797_v37 = vmul.f32 0.5, %v2933_v5  ;;  %v1850_v59 = vmul.f32 %v1834_v58, %v1811_v21 }
 0xa66   :  { %v2937_v29 = vpop.eup %2936  ;;  %v1857_v6 = vmul.f32 %v4163_v16, %v1809_v14  ;;  %v4172_v34 = vadd.f32 %v1800_v24, %v3434_v0  ;;  %v1798_v30 = vmul.f32 %v2935_v46, %v3426_v55  ;;  %v1849_v48 = vmul.f32 %v1833_v18, %v1809_v14 }
 0xa67   :  { %v2939_v19 = vpop.eup %2938  ;;  %1875 = vrot.lane.b32.xlu0 %v1858_v11, %s3114_s3  ;;  %v1813_v23 = vadd.f32 0.5, %v1797_v37  ;;  %v1805_v63 = vmul.f32 0.5, %v2937_v29  ;;  %v1852_v49 = vmul.f32 %v1836_v25, %v1815_v45  ;;  %v1840_v18 = vrot.slane %v4081_v28, 7 }
 0xa68   :  { %v2941_v62 = vpop.eup %2940  ;;  %1873 = vrot.lane.b32.xlu1 %v1857_v6, %s3114_s3  ;;  %v4180_v43 = vadd.f32 %v1798_v30, %v3434_v0  ;;  %v1806_v31 = vmul.f32 %v2939_v19, %v3426_v55  ;;  %v1860_v42 = vmul.f32 %v4172_v34, %v1815_v45  ;;  %v1820_v37 = vadd.f32 %v1804_v60, %v3434_v0 }
 0xa69   :  { %v2943_v26 = vpop.eup %2942  ;;  %v1821_v3 = vadd.f32 0.5, %v1805_v63  ;;  %v1801_v1 = vmul.f32 0.5, %v2941_v62  ;;  %v1851_v9 = vmul.f32 %v1835_v50, %v1813_v23  ;;  %v1838_v29 = vrot.slane %v4077_v8, 7 }
 0xa6a   :  { %v2945_v39 = vpop.eup %2944  ;;  %v1859_v2 = vmul.f32 %v4180_v43, %v1813_v23  ;;  %v4186_v15 = vadd.f32 %v1806_v31, %v3434_v0  ;;  %v1802_v7 = vmul.f32 %v2943_v26, %v3426_v55 }
 0xa6b   :  { %v2947_v17 = vpop.eup %2946  ;;  %1879 = vrot.lane.b32.xlu0 %v1860_v42, %s3114_s3  ;;  %v1817_v58 = vadd.f32 0.5, %v1801_v1  ;;  %v1807_v21 = vmul.f32 0.5, %v2945_v39  ;;  %v1855_v40 = vmul.f32 %v1839_v22, %v1821_v3 }
 0xa6c   :  { %v2949_v5 = vpop.eup %2948  ;;  %1877 = vrot.lane.b32.xlu1 %v1859_v2, %s3114_s3  ;;  %v1818_v25 = vadd.f32 %v1802_v7, %v3434_v0  ;;  %v1808_v14 = vmul.f32 %v2947_v17, %v3426_v55  ;;  %v1863_v24 = vmul.f32 %v4186_v15, %v1821_v3 }
 0xa6d   :  { %v1823_v20 = vadd.f32 0.5, %v1807_v21  ;;  %v1803_v46 = vmul.f32 0.5, %v2949_v5  ;;  %v1853_v11 = vmul.f32 %v1837_v57, %v1817_v58 }
 0xa6e   :  { %v1861_v38 = vmul.f32 %v1818_v25, %v1817_v58  ;;  %v1824_v45 = vadd.f32 %v1808_v14, %v3434_v0 }
 0xa6f   :  { %1885 = vrot.lane.b32.xlu0 %v1863_v24, %s3114_s3  ;;  %v1819_v28 = vadd.f32 0.5, %v1803_v46  ;;  %v1856_v6 = vmul.f32 %v1840_v18, %v1823_v20 }
 0xa70   :  { %1881 = vrot.lane.b32.xlu1 %v1861_v38, %s3114_s3  ;;  %v1864_v30 = vmul.f32 %v1824_v45, %v1823_v20 }
 0xa71   :  { %v1854_v19 = vmul.f32 %v1838_v29, %v1819_v28  ;;  %v1862_v50 = vmul.f32 %v1820_v37, %v1819_v28 }
 0xa73   :  { %1887 = vrot.lane.b32.xlu0 %v1864_v30, %s3114_s3 }
 0xa74   :  { %1883 = vrot.lane.b32.xlu1 %v1862_v50, %s3114_s3 }
 0xad9   :  { %v1876_v23 = vpop.permute.xlu0 %1875 }
 0xada   :  { %v4204_v63 = vadd.f32 %v1876_v23, %v1850_v59  ;;  %v1874_v62 = vpop.permute.xlu1 %1873 }
 0xadb   :  { %v4206_v22 = vadd.f32 %v1874_v62, %v1849_v48 }
 0xadc   :  { %2950 = vtanh.f32 %v4204_v63 }
 0xadd   :  { %2952 = vtanh.f32 %v4206_v22  ;;  %v1880_v8 = vpop.permute.xlu0 %1879 }
 0xade   :  { %v4210_v31 = vadd.f32 %v1880_v8, %v1852_v49  ;;  %v1878_v26 = vpop.permute.xlu1 %1877 }
 0xadf   :  { %v4212_v42 = vadd.f32 %v1878_v26, %v1851_v9 }
 0xae0   :  { %2954 = vtanh.f32 %v4210_v31 }
 0xae1   :  { %2956 = vtanh.f32 %v4212_v42  ;;  %v1886_v3 = vpop.permute.xlu0 %1885 }
 0xae2   :  { %v4216_v59 = vadd.f32 %v1886_v3, %v1855_v40  ;;  %v1882_v1 = vpop.permute.xlu1 %1881 }
 0xae3   :  { %v4218_v48 = vadd.f32 %v1882_v1, %v1853_v11 }
 0xae4   :  { %2958 = vtanh.f32 %v4216_v59 }
 0xae5   :  { %2960 = vtanh.f32 %v4218_v48  ;;  %v1888_v39 = vpop.permute.xlu0 %1887 }
 0xae6   :  { %v4222_v49 = vadd.f32 %v1888_v39, %v1856_v6  ;;  %v1884_v2 = vpop.permute.xlu1 %1883 }
 0xae7   :  { %v4224_v9 = vadd.f32 %v1884_v2, %v1854_v19 }
 0xae8   :  { %2962 = vtanh.f32 %v4222_v49 }
 0xae9   :  { %v2951_v7 = vpop.eup %2950  ;;  %2964 = vtanh.f32 %v4224_v9 }
 0xaea   :  { %v2953_v60 = vpop.eup %2952  ;;  %v1914_v17 = vmul.f32 %v2951_v7, %v4160_v13 }
 0xaeb   :  { %v1913_v57 = vmul.f32 %v2953_v60, %v4163_v16 }
 0xaec   :  { %v1930_v58 = vrot.slane %v1914_v17, 4 }
 0xaed   :  { %v2955_v21 = vpop.eup %2954  ;;  %v1929_v40 = vrot.slane %v1913_v57, 5 }
 0xaee   :  { %v2957_v5 = vpop.eup %2956  ;;  %v1916_v18 = vmul.f32 %v2955_v21, %v4172_v34 }
 0xaef   :  { %v1915_v14 = vmul.f32 %v2957_v5, %v4180_v43  ;;  %v1931_v24 = vsel %vm478_vm3, %v1930_v58, %v1929_v40 }
 0xaf0   :  { %v1934_v20 = vrot.slane %v1916_v18, 2 }
 0xaf1   :  { %v2959_v46 = vpop.eup %2958  ;;  %v1932_v11 = vrot.slane %v1915_v14, 3 }
 0xaf2   :  { %v2961_v38 = vpop.eup %2960  ;;  %v1919_v13 = vmul.f32 %v2959_v46, %v4186_v15 }
 0xaf3   :  { %v1917_v29 = vmul.f32 %v2961_v38, %v1818_v25  ;;  %v1933_v28 = vsel %vm481_vm4, %v1932_v11, %v1931_v24 }
 0xaf4   :  { %v1935_v16 = vsel %vm484_vm5, %v1934_v20, %v1933_v28  ;;  %v1939_v23 = vrot.slane %v1919_v13, 7 }
 0xaf5   :  { %v2963_v6 = vpop.eup %2962  ;;  %v1936_v30 = vrot.slane %v1917_v29, 1 }
 0xaf6   :  { %v2965_v19 = vpop.eup %2964  ;;  %v1920_v50 = vmul.f32 %v2963_v6, %v1824_v45 }
 0xaf7   :  { %v1918_v34 = vmul.f32 %v2965_v19, %v1820_v37  ;;  %v1937_v43 = vsel %vm487_vm6, %v1936_v30, %v1935_v16 }
 0xaf8   :  { %v1941_v62 = vrot.slane %v1920_v50, 6 }
 0xaf9   :  { %v1938_v8 = vsel %vm490_vm7, %v1918_v34, %v1937_v43 }
 0xafa   :  { %v1940_v26 = vsel %vm493_vm8, %v1939_v23, %v1938_v8 }
 0xafb   :  { %v1942_v25 = vsel %vm496_vm9, %v1941_v62, %v1940_v26 }
 0xafc   :  { %1943 = vrot.lane.b32.xlu1 %v1942_v25, %s3114_s3 }
 0xb6e   :  { %v1944_v15 = vpop.permute.xlu1 %1943 }
 0xb6f   :  { %2641 = vmatmul.mubr.msk.f32.vlgmr.msra.gmra.mxu0 %vm226_vm10, %v1944_v15 }
 0xb70   :  { %2670 = vmatprep.mubr.msk.f32.mxu0 %vm3115_vm11, %v4494_v54 }
 0xc2f   :  { %v2013_v3 = vpop.f32.mrf.mxu0 }
 0xc30   :  { %v2022_v39 = vrot.slane %v2013_v3, 3  ;;  %v2020_v2 = vrot.slane %v2013_v3, 2  ;;  %v2026_v7 = vrot.slane %v2013_v3, 5  ;;  %v2024_v21 = vrot.slane %v2013_v3, 4 }
 0xc31   :  { %v2015_v1 = vpop.f32.mrf.mxu0  ;;  %v2030_v5 = vrot.slane %v2013_v3, 7  ;;  %v2028_v38 = vrot.slane %v2013_v3, 6  ;;  %v2032_v6 = vrot.slane %v2013_v3, 1  ;;  %v2062_v34 = vadd.f32 %v2013_v3, %v4497_v47 }
 0xc32   :  { %v2021_v45 = vrot.slane %v2015_v1, 2  ;;  %v2023_v37 = vrot.slane %v2015_v1, 3  ;;  %v2027_v60 = vrot.slane %v2015_v1, 5  ;;  %v2063_v17 = vadd.f32 %v2015_v1, %v4498_v33 }
 0xc33   :  { %v2025_v40 = vrot.slane %v2015_v1, 4  ;;  %v2052_v18 = vadd.f32 %v2022_v39, %v3378_v56  ;;  %v2050_v14 = vadd.f32 %v2020_v2, %v3358_v44  ;;  %v2056_v24 = vadd.f32 %v2026_v7, %v3392_v4 }
 0xc34   :  { %v2051_v57 = vadd.f32 %v2021_v45, %v3366_v51  ;;  %v2053_v58 = vadd.f32 %v2023_v37, %v3384_v61  ;;  %2966 = vtanh.f32 %v2063_v17  ;;  %v2031_v20 = vrot.slane %v2015_v1, 7 }
 0xc35   :  { %v2057_v46 = vadd.f32 %v2027_v60, %v3396_v10  ;;  %v2054_v11 = vadd.f32 %v2024_v21, %v3369_v52  ;;  %v2029_v29 = vrot.slane %v2015_v1, 6  ;;  %v2055_v28 = vadd.f32 %v2025_v40, %v3372_v53 }
 0xc36   :  { %2968 = vtanh.f32 %v2053_v58  ;;  %v2060_v13 = vadd.f32 %v2030_v5, %v3411_v35  ;;  %v2061_v16 = vadd.f32 %v2031_v20, %v3417_v41  ;;  %v2033_v30 = vrot.slane %v2015_v1, 1 }
 0xc37   :  { %2970 = vtanh.f32 %v2051_v57  ;;  %v2058_v19 = vadd.f32 %v2028_v38, %v3402_v27  ;;  %v2059_v50 = vadd.f32 %v2029_v29, %v3407_v32  ;;  %v2064_v43 = vadd.f32 %v2032_v6, %v3437_v12 }
 0xc38   :  { %2972 = vtanh.f32 %v2052_v18  ;;  %v2065_v23 = vadd.f32 %v2033_v30, %v3446_v36  ;;  %v2123_v17 = vrot.slane %v4204_v63, 7  ;;  %v2122_v40 = vrot.slane %v4206_v22, 7 }
 0xc39   :  { %2974 = vtanh.f32 %v2050_v14  ;;  %v2125_v5 = vrot.slane %v4210_v31, 7  ;;  %v2124_v31 = vrot.slane %v4212_v42, 7 }
 0xc3a   :  { %2976 = vtanh.f32 %v2056_v24 }
 0xc3b   :  { %2978 = vtanh.f32 %v2057_v46 }
 0xc3c   :  { %2980 = vtanh.f32 %v2054_v11 }
 0xc3d   :  { %2982 = vtanh.f32 %v2055_v28 }
 0xc3e   :  { %2984 = vtanh.f32 %v2060_v13 }
 0xc3f   :  { %2986 = vtanh.f32 %v2061_v16 }
 0xc40   :  { %2988 = vtanh.f32 %v2058_v19 }
 0xc41   :  { %2990 = vtanh.f32 %v2059_v50  ;;  %v2967_v62 = vpop.eup %2966 }
 0xc42   :  { %2992 = vtanh.f32 %v2062_v34  ;;  %v2127_v34 = vrot.slane %v4224_v9, 7 }
 0xc43   :  { %v2969_v8 = vpop.eup %2968  ;;  %2994 = vtanh.f32 %v2064_v43 }
 0xc44   :  { %v2971_v26 = vpop.eup %2970  ;;  %v2085_v25 = vmul.f32 %v2969_v8, %v3426_v55  ;;  %2996 = vtanh.f32 %v2065_v23  ;;  %v2095_v8 = vmul.f32 %v2967_v62, %v3426_v55 }
 0xc45   :  { %v2973_v15 = vpop.eup %2972  ;;  %v2083_v1 = vmul.f32 %v2971_v26, %v3426_v55 }
 0xc46   :  { %v2975_v39 = vpop.eup %2974  ;;  %v2084_v3 = vmul.f32 0.5, %v2973_v15  ;;  %v4261_v45 = vadd.f32 %v2085_v25, %v3434_v0 }
 0xc47   :  { %v2977_v37 = vpop.eup %2976  ;;  %v2082_v2 = vmul.f32 0.5, %v2975_v39  ;;  %v4264_v7 = vadd.f32 %v2083_v1, %v3434_v0 }
 0xc48   :  { %v2979_v60 = vpop.eup %2978  ;;  %v2100_v57 = vadd.f32 0.5, %v2084_v3  ;;  %v2088_v58 = vmul.f32 0.5, %v2977_v37 }
 0xc49   :  { %v2981_v21 = vpop.eup %2980  ;;  %v2098_v18 = vadd.f32 0.5, %v2082_v2  ;;  %v2089_v14 = vmul.f32 %v2979_v60, %v3426_v55  ;;  %v2126_v60 = vrot.slane %v4218_v48, 7 }
 0xc4a   :  { %v2983_v24 = vpop.eup %2982  ;;  %v2147_v20 = vmul.f32 %v4261_v45, %v2100_v57  ;;  %v2104_v46 = vadd.f32 0.5, %v2088_v58  ;;  %v2086_v11 = vmul.f32 0.5, %v2981_v21  ;;  %v2139_v38 = vmul.f32 %v2123_v17, %v2100_v57 }
 0xc4b   :  { %v2985_v29 = vpop.eup %2984  ;;  %v2146_v28 = vmul.f32 %v4264_v7, %v2098_v18  ;;  %v4273_v63 = vadd.f32 %v2089_v14, %v3434_v0  ;;  %v2087_v13 = vmul.f32 %v2983_v24, %v3426_v55  ;;  %v2138_v22 = vmul.f32 %v2122_v40, %v2098_v18 }
 0xc4c   :  { %v2987_v16 = vpop.eup %2986  ;;  %2164 = vrot.lane.b32.xlu1 %v2147_v20, %s3114_s3  ;;  %v2102_v6 = vadd.f32 0.5, %v2086_v11  ;;  %v2092_v30 = vmul.f32 0.5, %v2985_v29  ;;  %v2141_v19 = vmul.f32 %v2125_v5, %v2104_v46  ;;  %v2128_v21 = vrot.slane %v4216_v59, 7 }
 0xc4d   :  { %v2989_v50 = vpop.eup %2988  ;;  %2162 = vrot.lane.b32.xlu0 %v2146_v28, %s3114_s3  ;;  %v4281_v43 = vadd.f32 %v2087_v13, %v3434_v0  ;;  %v2093_v23 = vmul.f32 %v2987_v16, %v3426_v55  ;;  %v2149_v42 = vmul.f32 %v4273_v63, %v2104_v46  ;;  %v4297_v5 = vadd.f32 %v2095_v8, %v3434_v0 }
 0xc4e   :  { %v2991_v26 = vpop.eup %2990  ;;  %v2108_v25 = vadd.f32 0.5, %v2092_v30  ;;  %v2090_v15 = vmul.f32 0.5, %v2989_v50  ;;  %v2140_v1 = vmul.f32 %v2124_v31, %v2102_v6  ;;  %v2129_v46 = vrot.slane %v4222_v49, 7 }
 0xc4f   :  { %v2993_v39 = vpop.eup %2992  ;;  %v2148_v3 = vmul.f32 %v4281_v43, %v2102_v6  ;;  %v4288_v9 = vadd.f32 %v2093_v23, %v3434_v0  ;;  %v2091_v37 = vmul.f32 %v2991_v26, %v3426_v55 }
 0xc50   :  { %v2995_v2 = vpop.eup %2994  ;;  %2168 = vrot.lane.b32.xlu1 %v2149_v42, %s3114_s3  ;;  %v2106_v62 = vadd.f32 0.5, %v2090_v15  ;;  %v2094_v17 = vmul.f32 0.5, %v2993_v39  ;;  %v2143_v57 = vmul.f32 %v2127_v34, %v2108_v25 }
 0xc51   :  { %v2997_v58 = vpop.eup %2996  ;;  %2166 = vrot.lane.b32.xlu0 %v2148_v3, %s3114_s3  ;;  %v2107_v40 = vadd.f32 %v2091_v37, %v3434_v0  ;;  %v2096_v18 = vmul.f32 0.5, %v2995_v2  ;;  %v2151_v14 = vmul.f32 %v4288_v9, %v2108_v25 }
 0xc52   :  { %v2110_v24 = vadd.f32 0.5, %v2094_v17  ;;  %v2097_v48 = vmul.f32 %v2997_v58, %v3426_v55  ;;  %v2142_v20 = vmul.f32 %v2126_v60, %v2106_v62 }
 0xc53   :  { %v2150_v11 = vmul.f32 %v2107_v40, %v2106_v62  ;;  %v2112_v29 = vadd.f32 0.5, %v2096_v18 }
 0xc54   :  { %2172 = vrot.lane.b32.xlu1 %v2151_v14, %s3114_s3  ;;  %v2113_v59 = vadd.f32 %v2097_v48, %v3434_v0  ;;  %v2144_v28 = vmul.f32 %v2128_v21, %v2110_v24  ;;  %v2152_v16 = vmul.f32 %v4297_v5, %v2110_v24 }
 0xc55   :  { %2170 = vrot.lane.b32.xlu0 %v2150_v11, %s3114_s3  ;;  %v2145_v13 = vmul.f32 %v2129_v46, %v2112_v29 }
 0xc56   :  { %v2153_v31 = vmul.f32 %v2113_v59, %v2112_v29 }
 0xc58   :  { %2174 = vrot.lane.b32.xlu1 %v2152_v16, %s3114_s3 }
 0xc59   :  { %2176 = vrot.lane.b32.xlu0 %v2153_v31, %s3114_s3 }
 0xcbe   :  { %v2165_v6 = vpop.permute.xlu1 %2164 }
 0xcbf   :  { %v4308_v30 = vadd.f32 %v2165_v6, %v2139_v38  ;;  %v2163_v49 = vpop.permute.xlu0 %2162 }
 0xcc0   :  { %v4310_v50 = vadd.f32 %v2163_v49, %v2138_v22 }
 0xcc1   :  { %2998 = vtanh.f32 %v4308_v30 }
 0xcc2   :  { %3000 = vtanh.f32 %v4310_v50  ;;  %v2169_v34 = vpop.permute.xlu1 %2168 }
 0xcc3   :  { %v4314_v23 = vadd.f32 %v2169_v34, %v2141_v19  ;;  %v2167_v8 = vpop.permute.xlu0 %2166 }
 0xcc4   :  { %v4316_v26 = vadd.f32 %v2167_v8, %v2140_v1 }
 0xcc5   :  { %3002 = vtanh.f32 %v4314_v23 }
 0xcc6   :  { %3004 = vtanh.f32 %v4316_v26  ;;  %v2173_v42 = vpop.permute.xlu1 %2172 }
 0xcc7   :  { %v4320_v38 = vadd.f32 %v2173_v42, %v2143_v57  ;;  %v2171_v25 = vpop.permute.xlu0 %2170 }
 0xcc8   :  { %v4322_v22 = vadd.f32 %v2171_v25, %v2142_v20 }
 0xcc9   :  { %3006 = vtanh.f32 %v4320_v38 }
 0xcca   :  { %3008 = vtanh.f32 %v4322_v22  ;;  %v2175_v15 = vpop.permute.xlu1 %2174 }
 0xccb   :  { %v4326_v19 = vadd.f32 %v2175_v15, %v2144_v28  ;;  %v2177_v39 = vpop.permute.xlu0 %2176 }
 0xccc   :  { %v4328_v1 = vadd.f32 %v2177_v39, %v2145_v13 }
 0xccd   :  { %3010 = vtanh.f32 %v4326_v19 }
 0xcce   :  { %v2999_v3 = vpop.eup %2998  ;;  %3012 = vtanh.f32 %v4328_v1 }
 0xccf   :  { %v3001_v37 = vpop.eup %3000  ;;  %v2203_v2 = vmul.f32 %v2999_v3, %v4261_v45 }
 0xcd0   :  { %v2202_v60 = vmul.f32 %v3001_v37, %v4264_v7 }
 0xcd1   :  { %v2219_v62 = vrot.slane %v2203_v2, 5 }
 0xcd2   :  { %v3003_v17 = vpop.eup %3002  ;;  %v2218_v57 = vrot.slane %v2202_v60, 6 }
 0xcd3   :  { %v3005_v58 = vpop.eup %3004  ;;  %v2205_v21 = vmul.f32 %v3003_v17, %v4273_v63 }
 0xcd4   :  { %v2204_v18 = vmul.f32 %v3005_v58, %v4281_v43  ;;  %v2220_v14 = vsel %vm478_vm3, %v2219_v62, %v2218_v57 }
 0xcd5   :  { %v2223_v24 = vrot.slane %v2205_v21, 3 }
 0xcd6   :  { %v3007_v48 = vpop.eup %3006  ;;  %v2221_v20 = vrot.slane %v2204_v18, 4 }
 0xcd7   :  { %v3009_v46 = vpop.eup %3008  ;;  %v2207_v11 = vmul.f32 %v3007_v48, %v4288_v9 }
 0xcd8   :  { %v2206_v29 = vmul.f32 %v3009_v46, %v2107_v40  ;;  %v2222_v45 = vsel %vm481_vm4, %v2221_v20, %v2220_v14 }
 0xcd9   :  { %v2224_v7 = vsel %vm484_vm5, %v2223_v24, %v2222_v45  ;;  %v2227_v28 = vrot.slane %v2207_v11, 1 }
 0xcda   :  { %v3011_v13 = vpop.eup %3010  ;;  %v2225_v16 = vrot.slane %v2206_v29, 2 }
 0xcdb   :  { %v3013_v31 = vpop.eup %3012  ;;  %v2208_v63 = vmul.f32 %v3011_v13, %v4297_v5 }
 0xcdc   :  { %v2209_v43 = vmul.f32 %v3013_v31, %v2113_v59  ;;  %v2226_v6 = vsel %vm487_vm6, %v2225_v16, %v2224_v7 }
 0xcdd   :  { %v2228_v49 = vsel %vm490_vm7, %v2227_v28, %v2226_v6  ;;  %v2413_v6 = vrot.slane %v4316_v26, 7 }
 0xcde   :  { %v2229_v34 = vsel %vm493_vm8, %v2208_v63, %v2228_v49  ;;  %v2230_v8 = vrot.slane %v2209_v43, 7  ;;  %v2411_v63 = vrot.slane %v4310_v50, 7  ;;  %v2414_v43 = vrot.slane %v4314_v23, 7 }
 0xcdf   :  { %v2418_v50 = vrot.slane %v4328_v1, 7 }
 0xce0   :  { %v2231_v9 = vsel %vm496_vm9, %v2230_v8, %v2229_v34  ;;  %v2416_v8 = vrot.slane %v4320_v38, 7 }
 0xce1   :  { %2232 = vrot.lane.b32.xlu0 %v2231_v9, %s3114_s3  ;;  %v2415_v9 = vrot.slane %v4322_v22, 7 }
 0xd53   :  { %v2233_v40 = vpop.permute.xlu0 %2232 }
 0xd54   :  { %2642 = vmatmul.mubr.msk.f32.vlgmr.msra.gmra.mxu1 %vm226_vm10, %v2233_v40 }
 0xe14   :  { %v2302_v42 = vpop.f32.mrf.mxu1 }
 0xe15   :  { %v2311_v21 = vrot.slane %v2302_v42, 2  ;;  %v2309_v14 = vrot.slane %v2302_v42, 1  ;;  %v2315_v48 = vrot.slane %v2302_v42, 4  ;;  %v2317_v20 = vrot.slane %v2302_v42, 5 }
 0xe16   :  { %v2304_v25 = vpop.f32.mrf.mxu1  ;;  %v2321_v46 = vrot.slane %v2302_v42, 7 }
 0xe17   :  { %v2310_v15 = vrot.slane %v2304_v25, 1  ;;  %v2312_v39 = vrot.slane %v2304_v25, 2  ;;  %v2314_v5 = vrot.slane %v2304_v25, 3  ;;  %v2316_v59 = vrot.slane %v2304_v25, 4 }
 0xe18   :  { %v2318_v3 = vrot.slane %v2304_v25, 5  ;;  %v2320_v37 = vrot.slane %v2304_v25, 6  ;;  %v2354_v2 = vadd.f32 %v2304_v25, %v3446_v36  ;;  %v2322_v60 = vrot.slane %v2304_v25, 7 }
 0xe19   :  { %v2340_v62 = vadd.f32 %v2310_v15, %v3366_v51  ;;  %v2342_v17 = vadd.f32 %v2312_v39, %v3384_v61  ;;  %v2344_v57 = vadd.f32 %v2314_v5, %v3372_v53  ;;  %v2346_v58 = vadd.f32 %v2316_v59, %v3396_v10 }
 0xe1a   :  { %3014 = vtanh.f32 %v2354_v2  ;;  %v2348_v18 = vadd.f32 %v2318_v3, %v3407_v32  ;;  %v2350_v24 = vadd.f32 %v2320_v37, %v3417_v41  ;;  %v2352_v36 = vadd.f32 %v2322_v60, %v4498_v33 }
 0xe1b   :  { %3016 = vtanh.f32 %v2340_v62  ;;  %v2313_v51 = vrot.slane %v2302_v42, 3  ;;  %v2341_v61 = vadd.f32 %v2311_v21, %v3378_v56  ;;  %v2319_v53 = vrot.slane %v2302_v42, 6 }
 0xe1c   :  { %3018 = vtanh.f32 %v2342_v17  ;;  %v2339_v10 = vadd.f32 %v2309_v14, %v3358_v44  ;;  %v2345_v32 = vadd.f32 %v2315_v48, %v3392_v4  ;;  %v2347_v11 = vadd.f32 %v2317_v20, %v3402_v27 }
 0xe1d   :  { %3020 = vtanh.f32 %v2344_v57  ;;  %v2343_v41 = vadd.f32 %v2313_v51, %v3369_v52  ;;  %v2349_v33 = vadd.f32 %v2319_v53, %v3411_v35  ;;  %v2353_v56 = vadd.f32 %v2302_v42, %v3437_v12 }
 0xe1e   :  { %3022 = vtanh.f32 %v2346_v58  ;;  %v2351_v44 = vadd.f32 %v2321_v46, %v4497_v47  ;;  %v2412_v12 = vrot.slane %v4308_v30, 7  ;;  %v2417_v25 = vrot.slane %v4326_v19, 7 }
 0xe1f   :  { %3024 = vtanh.f32 %v2348_v18 }
 0xe20   :  { %3026 = vtanh.f32 %v2350_v24 }
 0xe21   :  { %3028 = vtanh.f32 %v2352_v36 }
 0xe22   :  { %3030 = vtanh.f32 %v2341_v61 }
 0xe23   :  { %3032 = vtanh.f32 %v2339_v10 }
 0xe24   :  { %3034 = vtanh.f32 %v2345_v32 }
 0xe25   :  { %3036 = vtanh.f32 %v2343_v41 }
 0xe26   :  { %3038 = vtanh.f32 %v2349_v33 }
 0xe27   :  { %v3015_v29 = vpop.eup %3014  ;;  %3040 = vtanh.f32 %v2347_v11 }
 0xe28   :  { %v3017_v4 = vpop.eup %3016  ;;  %3042 = vtanh.f32 %v2353_v56  ;;  %v2386_v61 = vmul.f32 %v3015_v29, %v3426_v55 }
 0xe29   :  { %v3019_v45 = vpop.eup %3018  ;;  %3044 = vtanh.f32 %v2351_v44  ;;  %v2372_v27 = vmul.f32 %v3017_v4, %v3426_v55 }
 0xe2a   :  { %v3021_v52 = vpop.eup %3020  ;;  %v2374_v35 = vmul.f32 %v3019_v45, %v3426_v55 }
 0xe2b   :  { %v3023_v7 = vpop.eup %3022  ;;  %v2376_v47 = vmul.f32 %v3021_v52, %v3426_v55  ;;  %v4379_v23 = vadd.f32 %v2372_v27, %v3434_v0 }
 0xe2c   :  { %v3025_v28 = vpop.eup %3024  ;;  %v2378_v49 = vmul.f32 %v3023_v7, %v3426_v55  ;;  %v4374_v42 = vadd.f32 %v2374_v35, %v3434_v0  ;;  %v4409_v35 = vadd.f32 %v2386_v61, %v3434_v0 }
 0xe2d   :  { %v3027_v13 = vpop.eup %3026  ;;  %v4382_v38 = vadd.f32 %v2376_v47, %v3434_v0  ;;  %v2380_v22 = vmul.f32 %v3025_v28, %v3426_v55  ;;  %v2504_v47 = vld [vmem:[%s4481_s4 + $0x28] sm:$0xff] }
 0xe2e   :  { %v3029_v16 = vpop.eup %3028  ;;  %v4386_v37 = vadd.f32 %v2378_v49, %v3434_v0  ;;  %v2382_v1 = vmul.f32 %v3027_v13, %v3426_v55  ;;  %v2499_v49 = vld [vmem:[%s4481_s4] sm:$0xff] }
 0xe2f   :  { %v3031_v31 = vpop.eup %3030  ;;  %v4397_v20 = vadd.f32 %v2380_v22, %v3434_v0  ;;  %v2384_v29 = vmul.f32 %v3029_v16, %v3426_v55 }
 0xe30   :  { %v3033_v34 = vpop.eup %3032  ;;  %v2373_v40 = vmul.f32 0.5, %v3031_v31  ;;  %v4401_v33 = vadd.f32 %v2382_v1, %v3434_v0  ;;  %v2503_v31 = vld [vmem:[%s4481_s4 + $0x20] sm:$0xff] }
 0xe31   :  { %v3035_v30 = vpop.eup %3034  ;;  %v2371_v15 = vmul.f32 0.5, %v3033_v34  ;;  %v4413_v27 = vadd.f32 %v2384_v29, %v3434_v0  ;;  %v2505_v0 = vld [vmem:[%s4481_s4 + $0x30] sm:$0xff] }
 0xe32   :  { %v3037_v26 = vpop.eup %3036  ;;  %v2389_v39 = vadd.f32 0.5, %v2373_v40  ;;  %v2377_v5 = vmul.f32 0.5, %v3035_v30 }
 0xe33   :  { %v3039_v59 = vpop.eup %3038  ;;  %v2387_v3 = vadd.f32 0.5, %v2371_v15  ;;  %v2375_v19 = vmul.f32 0.5, %v3037_v26 }
 0xe34   :  { %v3041_v2 = vpop.eup %3040  ;;  %v2436_v60 = vmul.f32 %v4374_v42, %v2389_v39  ;;  %v2393_v62 = vadd.f32 0.5, %v2377_v5  ;;  %v2381_v17 = vmul.f32 0.5, %v3039_v59  ;;  %v4390_v57 = vmul.f32 %v2412_v12, %v2389_v39  ;;  %v2506_v12 = vld [vmem:[%s4481_s4 + $0x38] sm:$0xff] }
 0xe35   :  { %v3043_v58 = vpop.eup %3042  ;;  %v2435_v21 = vmul.f32 %v4379_v23, %v2387_v3  ;;  %v2391_v18 = vadd.f32 0.5, %v2375_v19  ;;  %v2379_v14 = vmul.f32 0.5, %v3041_v2  ;;  %v2427_v24 = vmul.f32 %v2411_v63, %v2387_v3  ;;  %2655 = vmatpush3.msra.mxu0 %v2506_v12  ;;  %v2502_v63 = vld [vmem:[%s4481_s4 + $0x18] sm:$0xff] }
 0xe36   :  { %v3045_v48 = vpop.eup %3044  ;;  %2453 = vrot.lane.b32.xlu0 %v2436_v60, %s3114_s3  ;;  %v2397_v36 = vadd.f32 0.5, %v2381_v17  ;;  %v2385_v51 = vmul.f32 0.5, %v3043_v58  ;;  %v2430_v53 = vmul.f32 %v2414_v43, %v2393_v62  ;;  %v2438_v46 = vmul.f32 %v4386_v37, %v2393_v62  ;;  %2656 = vmatprep.subr.mxu0 %v4494_v54  ;;  %v2501_v43 = vld [vmem:[%s4481_s4 + $0x10] sm:$0xff] }
 0xe37   :  { %2451 = vrot.lane.b32.xlu1 %v2435_v21, %s3114_s3  ;;  %v2395_v10 = vadd.f32 0.5, %v2379_v14  ;;  %v2383_v32 = vmul.f32 0.5, %v3045_v48  ;;  %v2429_v41 = vmul.f32 %v2413_v6, %v2391_v18  ;;  %v2437_v44 = vmul.f32 %v4382_v38, %v2391_v18  ;;  %2657 = vmatpush3.msra.mxu0 %v2505_v0  ;;  %v2500_v6 = vld [vmem:[%s4481_s4 + $0x8] sm:$0xff] }
 0xe38   :  { %v2401_v11 = vadd.f32 0.5, %v2385_v51  ;;  %v2432_v56 = vmul.f32 %v2416_v8, %v2397_v36  ;;  %v2440_v28 = vmul.f32 %v4401_v33, %v2397_v36  ;;  %2658 = vmatprep.subr.mxu0 %v4494_v54 }
 0xe39   :  { %v2399_v4 = vadd.f32 0.5, %v2383_v32  ;;  %v2431_v45 = vmul.f32 %v2415_v9, %v2395_v10  ;;  %v2439_v13 = vmul.f32 %v4397_v20, %v2395_v10  ;;  %2659 = vmatpush3.msra.mxu0 %v2504_v47 }
 0xe3a   :  { %2457 = vrot.lane.b32.xlu0 %v2438_v46, %s3114_s3  ;;  %v2434_v52 = vmul.f32 %v2418_v50, %v2401_v11  ;;  %v2442_v55 = vmul.f32 %v4409_v35, %v2401_v11  ;;  %2660 = vmatprep.subr.mxu0 %v4494_v54 }
 0xe3b   :  { %2455 = vrot.lane.b32.xlu1 %v2437_v44, %s3114_s3  ;;  %v2433_v7 = vmul.f32 %v2417_v25, %v2399_v4  ;;  %v2441_v16 = vmul.f32 %v4413_v27, %v2399_v4  ;;  %2661 = vmatpush3.msra.mxu0 %v2503_v31 }
 0xe3c   :  { %2662 = vmatprep.subr.mxu0 %v4494_v54 }
 0xe3d   :  { %2663 = vmatpush3.msra.mxu0 %v2502_v63 }
 0xe3e   :  { %2461 = vrot.lane.b32.xlu0 %v2440_v28, %s3114_s3  ;;  %2664 = vmatprep.subr.mxu0 %v4494_v54 }
 0xe3f   :  { %2459 = vrot.lane.b32.xlu1 %v2439_v13, %s3114_s3  ;;  %2665 = vmatpush3.msra.mxu0 %v2501_v43 }
 0xe40   :  { %2666 = vmatprep.subr.mxu0 %v4494_v54 }
 0xe41   :  { %2667 = vmatpush3.msra.mxu0 %v2500_v6 }
 0xe42   :  { %2465 = vrot.lane.b32.xlu0 %v2442_v55, %s3114_s3  ;;  %2668 = vmatprep.subr.mxu0 %v4494_v54 }
 0xe43   :  { %2463 = vrot.lane.b32.xlu1 %v2441_v16, %s3114_s3  ;;  %2669 = vmatpush3.msra.mxu0 %v2499_v49 }
 0xea8   :  { %v2454_v34 = vpop.permute.xlu0 %2453 }
 0xea9   :  { %v2476_v8 = vadd.f32 %v2454_v34, %v4390_v57  ;;  %v2452_v9 = vpop.permute.xlu1 %2451 }
 0xeaa   :  { %v2475_v40 = vadd.f32 %v2452_v9, %v2427_v24 }
 0xeab   :  { %3046 = vtanh.f32 %v2476_v8 }
 0xeac   :  { %3048 = vtanh.f32 %v2475_v40  ;;  %v2458_v30 = vpop.permute.xlu0 %2457 }
 0xead   :  { %v2478_v25 = vadd.f32 %v2458_v30, %v2430_v53  ;;  %v2456_v50 = vpop.permute.xlu1 %2455 }
 0xeae   :  { %v2477_v15 = vadd.f32 %v2456_v50, %v2429_v41 }
 0xeaf   :  { %3050 = vtanh.f32 %v2478_v25 }
 0xeb0   :  { %3052 = vtanh.f32 %v2477_v15  ;;  %v2462_v26 = vpop.permute.xlu0 %2461 }
 0xeb1   :  { %v2480_v39 = vadd.f32 %v2462_v26, %v2432_v56  ;;  %v2460_v5 = vpop.permute.xlu1 %2459 }
 0xeb2   :  { %v2479_v22 = vadd.f32 %v2460_v5, %v2431_v45  ;;  %v2643_v45 = vld [vmem:[%s4482_s5] ss:$0 sm:$0xff] }
 0xeb3   :  { %3054 = vtanh.f32 %v2480_v39 }
 0xeb4   :  { %3056 = vtanh.f32 %v2479_v22  ;;  %v2466_v54 = vpop.permute.xlu0 %2465 }
 0xeb5   :  { %v2482_v59 = vadd.f32 %v2466_v54, %v2434_v52  ;;  %v2464_v3 = vpop.permute.xlu1 %2463 }
 0xeb6   :  { %v2481_v19 = vadd.f32 %v2464_v3, %v2433_v7 }
 0xeb8   :  { %v3047_v1 = vpop.eup %3046  ;;  %3058 = vtanh.f32 %v2481_v19 }
 0xeb9   :  { %v3049_v2 = vpop.eup %3048  ;;  %v2492_v60 = vmul.f32 %v3047_v1, %v4374_v42  ;;  %3060 = vtanh.f32 %v2482_v59 }
 0xeba   :  { %v2491_v62 = vmul.f32 %v3049_v2, %v4379_v23 }
 0xebb   :  { %v2523_v17 = vrot.slane %v2492_v60, 6 }
 0xebc   :  { %v3051_v57 = vpop.eup %3050  ;;  %v2522_v58 = vrot.slane %v2491_v62, 7 }
 0xebd   :  { %v3053_v21 = vpop.eup %3052  ;;  %v2494_v18 = vmul.f32 %v3051_v57, %v4386_v37 }
 0xebe   :  { %v2493_v14 = vmul.f32 %v3053_v21, %v4382_v38  ;;  %v2524_v24 = vsel %vm478_vm3, %v2523_v17, %v2522_v58 }
 0xebf   :  { %v2527_v48 = vrot.slane %v2494_v18, 4 }
 0xec0   :  { %v3055_v36 = vpop.eup %3054  ;;  %v2525_v51 = vrot.slane %v2493_v14, 5 }
 0xec1   :  { %v3057_v61 = vpop.eup %3056  ;;  %v2496_v53 = vmul.f32 %v3055_v36, %v4401_v33 }
 0xec2   :  { %v2495_v42 = vmul.f32 %v3057_v61, %v4397_v20  ;;  %v2526_v23 = vsel %vm481_vm4, %v2525_v51, %v2524_v24 }
 0xec3   :  { %v2528_v10 = vsel %vm484_vm5, %v2527_v48, %v2526_v23  ;;  %v2531_v32 = vrot.slane %v2496_v53, 2 }
 0xec4   :  { %v2529_v41 = vrot.slane %v2495_v42, 3 }
 0xec5   :  { %v3059_v46 = vpop.eup %3058 }
 0xec6   :  { %v3061_v37 = vpop.eup %3060  ;;  %v2497_v38 = vmul.f32 %v3059_v46, %v4413_v27  ;;  %v2530_v11 = vsel %vm487_vm6, %v2529_v41, %v2528_v10 }
 0xec7   :  { %v2532_v56 = vsel %vm490_vm7, %v2531_v32, %v2530_v11  ;;  %v2498_v29 = vmul.f32 %v3061_v37, %v4409_v35 }
 0xec8   :  { %v2533_v44 = vrot.slane %v2497_v38, 1 }
 0xeca   :  { %v2534_v33 = vsel %vm493_vm8, %v2533_v44, %v2532_v56 }
 0xecb   :  { %v2535_v20 = vsel %vm496_vm9, %v2498_v29, %v2534_v33 }
 0xecc   :  { %2536 = vrot.lane.b32.xlu1 %v2535_v20, %s3114_s3 }
 0xf3e   :  { %v2537_v4 = vpop.permute.xlu1 %2536 }
 0xf3f   :  { %2671 = vmatmul.mubr.msk.f32.vlgmr.msra.gmra.mxu0 %vm226_vm10, %v2537_v4 }
 0xfff   :  { %v2606_v52 = vpop.f32.mrf.mxu0 }
0x1000   :  { %v2607_v7 = vadd.f32 %v2643_v45, %v2606_v52 }
0x1001   :  { %v2672_v28 = vpop.f32.mrf.mxu0 }
0x1002   :  { %2611 = vst.msk [vmem:[#allocation2] sm:$0xff] %vm2610_vm12, %v2607_v7 }
0x1003   :  { %3101 = shalt.err (!%p3098_p4)
}
0x1004   :  { %2621 = dma.vmem_to_hbm [thread:$0]  %s2619_s1, 128, %s4483_s6, [#allocation3]  }
0x1005   :  { %3110 = dma.done.wait [#allocation3], 128  }
0x1006   :  { %3111 = vsyncadd [#allocation3], 4294967168 }
0x1007   :  { %2625 = vsyncpa [#allocation3], 1 }

</bundles_post_ra>
